<compile_context>
chip_gen: v7x
topology: tpu7x:2x2x1
jax: 0.10.0
libtpu: 0.0.40
codegen_flags: <defaults>
</compile_context>

<pallas_src>
import functools

import jax
import jax.numpy as jnp
import numpy as np
from jax import lax
from jax.experimental import pallas as pl
from jax.experimental.pallas import tpu as pltpu


def _div_mod(v, d):
    """v // d, v % d for an int32 array and a static positive int d
    (shift/mask when d is a power of two)."""
    if (d & (d - 1)) == 0:
        s = d.bit_length() - 1
        return v >> s, v & (d - 1)
    return v // d, v % d


def _bottleneck_kernel(x_ref, wp_ref, o_ref, *, H, W, Cemb, mm_dtype):
    HW = H * W
    Cin, lanes = x_ref.shape          # lanes = spb * HW (samples concatenated)
    wc = max(Cin, Cemb)               # bias column inside the packed weights

    def mm(w, v):                     # MXU matmul, f32 accumulation
        return jnp.dot(w.astype(mm_dtype), v.astype(mm_dtype),
                       preferred_element_type=jnp.float32)

    # ---- hoisted boundary masks (computed once per grid step) -------------
    # Coordinates derived from (lane % HW): an out-of-bounds source pixel of
    # the dilated conv is exactly a pixel whose roll wrapped either inside a
    # sample or across a sample boundary, so one mask handles both cases.
    lane = lax.broadcasted_iota(jnp.int32, (1, lanes), 1)
    _, q = _div_mod(lane, HW)
    fy, fx = _div_mod(q, W)
    m_yp = fy < (H - 2)               # source row y+2 in bounds
    m_ym = fy >= 2                    # source row y-2 in bounds
    m_xp = fx < (W - 2)               # source col x+2 in bounds
    m_xm = fx >= 2                    # source col x-2 in bounds

    def tap_mask(dy, dx):
        m = None
        if dy > 0:
            m = m_yp
        elif dy < 0:
            m = m_ym
        if dx > 0:
            m = m_xp if m is None else (m & m_xp)
        elif dx < 0:
            m = m_xm if m is None else (m & m_xm)
        return m

    # ---- packed, grid-invariant weights (resident in VMEM) ----------------
    r1, r2, r3, r4, r5 = 0, Cemb, 2 * Cemb, 11 * Cemb, 12 * Cemb
    w1 = wp_ref[r1:r1 + Cemb, 0:Cin]
    b1 = wp_ref[r1:r1 + Cemb, wc:wc + 1]
    w2 = wp_ref[r2:r2 + Cemb, 0:Cemb]
    b2 = wp_ref[r2:r2 + Cemb, wc:wc + 1]
    b3 = wp_ref[r3:r3 + Cemb, wc:wc + 1]
    w4 = wp_ref[r4:r4 + Cemb, 0:Cemb]
    b4 = wp_ref[r4:r4 + Cemb, wc:wc + 1]
    w5 = wp_ref[r5:r5 + Cin, 0:Cemb]
    b5 = wp_ref[r5:r5 + Cin, wc:wc + 1]

    x = x_ref[...].astype(jnp.float32)                    # (Cin, lanes)

    # conv_prj_inp: 1x1 conv (+folded BN) + ReLU           -> (Cemb, lanes)
    h = jnp.maximum(mm(w1, x) + b1, 0.0)
    # ASPP proj_inp: 1x1 conv (+folded BN) + ReLU
    h = jnp.maximum(mm(w2, h) + b2, 0.0)

    # ASPP conv: 3x3, dilation=2, padding=2 (+folded BN) + ReLU.
    # Nine accumulating matmuls; taps never touch a VMEM staging buffer.
    acc = None
    for t in range(9):
        ky, kx = t // 3, t % 3
        dy, dx = 2 * (ky - 1), 2 * (kx - 1)
        delta = dy * W + dx
        rolled = h if delta == 0 else pltpu.roll(h, shift=(-delta) % lanes, axis=1)
        m = tap_mask(dy, dx)
        tap = rolled if m is None else jnp.where(m, rolled, 0.0)
        w3t = wp_ref[r3 + t * Cemb:r3 + (t + 1) * Cemb, 0:Cemb]
        part = mm(w3t, tap)
        acc = part if acc is None else acc + part
    h = jnp.maximum(acc + b3, 0.0)

    # ASPP proj_out: 1x1 conv (+folded BN) + ReLU
    h = jnp.maximum(mm(w4, h) + b4, 0.0)

    # conv_prj_out: 1x1 conv (+folded BN), no activation    -> (Cin, lanes)
    y = mm(w5, h) + b5

    # attention_type=None -> Identity; residual add; output ReLU
    o_ref[...] = jnp.maximum(y + x, 0.0).astype(o_ref.dtype)


def _pick_spb(N):
    """Samples per grid step: ~32 (~256 KB f32 input block) amortizes the
    ~0.35us/step overhead; keep >=2 grid steps when the batch allows it (v7x
    has 2 TensorCores), otherwise run a single step (fine on 1-TC v5e/v6e)."""
    for cand in (32, 16, 8, 4, 2):
        if N % cand == 0 and N // cand >= 2:
            return cand
    return N


def bottleneck_aspp_se_block(x_nchw, p, *, samples_per_block=None,
                             matmul_dtype=jnp.float32):
    N, Cin, H, W = x_nchw.shape
    HW = H * W
    wpack = p["wpack"]
    Cemb = (wpack.shape[0] - Cin) // 12

    # One cheap NCHW -> CNHW transpose in the wrapper so every kernel stage
    # runs lane-dense with the batch folded onto the matmul lane axis.
    x = jnp.transpose(x_nchw, (1, 0, 2, 3)).reshape(Cin, N * HW)

    spb = _pick_spb(N) if samples_per_block is None else samples_per_block
    assert N % spb == 0, "samples_per_block must divide the batch"
    grid_n = N // spb
    lanes = spb * HW

    kernel = functools.partial(_bottleneck_kernel, H=H, W=W, Cemb=Cemb,
                               mm_dtype=matmul_dtype)

    out = pl.pallas_call(
        kernel,
        out_shape=jax.ShapeDtypeStruct((Cin, N * HW), x_nchw.dtype),
        grid_spec=pltpu.PrefetchScalarGridSpec(
            num_scalar_prefetch=0,
            grid=(grid_n,),
            in_specs=[
                pl.BlockSpec((Cin, lanes), lambda n: (0, n)),
                pl.BlockSpec(wpack.shape, lambda n: (0, 0)),   # resident consts
            ],
            out_specs=pl.BlockSpec((Cin, lanes), lambda n: (0, n)),
        ),
        compiler_params=pltpu.CompilerParams(
            dimension_semantics=("parallel",)),
    )(x, wpack)

    return jnp.transpose(out.reshape(Cin, N, H, W), (1, 0, 2, 3))


# ---------------- parameter setup (plain-JAX glue) ----------------

def _fold_bn(w_hwio, gamma, beta, mean, var, eps=1e-5):
    """Fold eval-mode BatchNorm2d into a bias-free conv (HWIO weight)."""
    scale = gamma / jnp.sqrt(var + eps)          # per out-channel
    return w_hwio * scale, (beta - mean * scale)


def init_params(key, inp_dim, emb_dim):
    ks = jax.random.split(key, 10)

    def conv(k, kh, kw, cin, cout):
        return jax.random.normal(k, (kh, kw, cin, cout), jnp.float32) * 0.1

    def bn(k, c):
        k1, k2, k3, k4 = jax.random.split(k, 4)
        gamma = jax.random.uniform(k1, (c,), minval=0.5, maxval=1.5)
        beta = jax.random.normal(k2, (c,)) * 0.1
        mean = jax.random.normal(k3, (c,)) * 0.1
        var = jax.random.uniform(k4, (c,), minval=0.5, maxval=1.5)
        return gamma, beta, mean, var

    # stage 1: conv_prj_inp (1x1, inp->emb) + BN
    w1, b1 = _fold_bn(conv(ks[0], 1, 1, inp_dim, emb_dim), *bn(ks[1], emb_dim))
    # stage 2: ASPP proj_inp (1x1, emb->emb) + BN
    w2, b2 = _fold_bn(conv(ks[2], 1, 1, emb_dim, emb_dim), *bn(ks[3], emb_dim))
    # stage 3: ASPP conv (3x3, dilation=2, emb->emb) + BN
    w3, b3 = _fold_bn(conv(ks[4], 3, 3, emb_dim, emb_dim), *bn(ks[5], emb_dim))
    # stage 4: ASPP proj_out (1x1, emb->emb) + BN
    w4, b4 = _fold_bn(conv(ks[6], 1, 1, emb_dim, emb_dim), *bn(ks[7], emb_dim))
    # stage 5: conv_prj_out (1x1, emb->inp) + BN, no activation
    w5, b5 = _fold_bn(conv(ks[8], 1, 1, emb_dim, inp_dim), *bn(ks[9], inp_dim))

    # Pack every (tiny, grid-invariant) weight/bias into ONE array: one DMA
    # descriptor, one resident VMEM constant.  Row layout (Cemb rows/stage,
    # 9 stacked per-tap (Cout,Cin) blocks for stage 3, Cin rows for stage 5);
    # weights in cols [0, K), bias in column `wc`.
    wc = max(inp_dim, emb_dim)
    rows = 12 * emb_dim + inp_dim
    pack = np.zeros((rows, wc + 1), np.float32)

    def put(r, w_oi, b):                       # w_oi: (cout, cin)
        co, ci = w_oi.shape
        pack[r:r + co, 0:ci] = np.asarray(w_oi)
        pack[r:r + co, wc] = np.asarray(b)

    put(0 * emb_dim, np.asarray(w1[0, 0]).T, b1)           # stage 1
    put(1 * emb_dim, np.asarray(w2[0, 0]).T, b2)           # stage 2
    w3_np = np.asarray(w3)                                  # (3,3,cin,cout)
    for t in range(9):                                      # stage 3 taps
        ky, kx = t // 3, t % 3
        pack[(2 + t) * emb_dim:(3 + t) * emb_dim, 0:emb_dim] = w3_np[ky, kx].T
    pack[2 * emb_dim:3 * emb_dim, wc] = np.asarray(b3)
    put(11 * emb_dim, np.asarray(w4[0, 0]).T, b4)           # stage 4
    put(12 * emb_dim, np.asarray(w5[0, 0]).T, b5)           # stage 5

    return {
        "wpack": jnp.asarray(pack),
        # pure-JAX reference forms
        "w1": w1[0, 0], "w2": w2[0, 0], "w3_hwio": w3,
        "w4": w4[0, 0], "w5": w5[0, 0],
        "b1": b1, "b2": b2, "b3": b3, "b4": b4, "b5": b5,
    }


# ---------------- pure-JAX reference for validation ----------------

def ref_forward(x_nchw, p):
    x = jnp.transpose(x_nchw, (0, 2, 3, 1))
    relu = lambda v: jnp.maximum(v, 0.0)

    def c1(h, w, b):
        return jnp.einsum("nhwc,cd->nhwd", h, w,
                          precision=lax.Precision.HIGHEST) + b.reshape(1, 1, 1, -1)

    h = relu(c1(x, p["w1"], p["b1"]))
    h = relu(c1(h, p["w2"], p["b2"]))
    h = lax.conv_general_dilated(
        h, p["w3_hwio"], window_strides=(1, 1),
        padding=((2, 2), (2, 2)), rhs_dilation=(2, 2),
        dimension_numbers=("NHWC", "HWIO", "NHWC"),
        precision=lax.Precision.HIGHEST) + p["b3"].reshape(1, 1, 1, -1)
    h = relu(h)
    h = relu(c1(h, p["w4"], p["b4"]))
    y = c1(h, p["w5"], p["b5"])
    y = relu(y + x)
    return jnp.transpose(y, (0, 3, 1, 2))


if __name__ == "__main__":
    N, INP_DIM, EMB_DIM, H, W = 2, 8, 16, 16, 16

    key = jax.random.PRNGKey(0)
    kx, kp = jax.random.split(key)
    x = jax.random.normal(kx, (N, INP_DIM, H, W), jnp.float32)   # NCHW, as PyTorch
    params = init_params(kp, INP_DIM, EMB_DIM)

    out = jax.block_until_ready(bottleneck_aspp_se_block(x, params))
    ref = jax.block_until_ready(ref_forward(x, params))
    assert out.shape == (N, INP_DIM, H, W)
    np.testing.assert_allclose(np.asarray(out), np.asarray(ref),
                               rtol=2e-3, atol=2e-3)

    # bf16 MXU-operand variant (v6e/v7x recommendation): f32 accumulation,
    # checked against the Precision.HIGHEST f32 reference at loose tolerance.
    out_bf16 = jax.block_until_ready(
        bottleneck_aspp_se_block(x, params, matmul_dtype=jnp.bfloat16))
    np.testing.assert_allclose(np.asarray(out_bf16), np.asarray(ref),
                               rtol=5e-2, atol=5e-2)

    print("KERNEL_OK")
</pallas_src>

<mosaic_0001>
module attributes {stable_mosaic.version = 11 : i64} {
  func.func @_bottleneck_kernel(%arg0: i32, %arg1: memref<8x512xf32, #tpu.memory_space<vmem>>, %arg2: memref<200x17xf32, #tpu.memory_space<vmem>>, %arg3: memref<8x512xf32, #tpu.memory_space<vmem>>) attributes {dimension_semantics = [#tpu.dimension_semantics<parallel>], iteration_bounds = array<i64: 1>, scalar_prefetch = 0 : i64, scratch_operands = 0 : i64, tpu.core_type = #tpu.core_type<tc>, window_params = [{transform_indices = @transform_0, window_bounds = array<i64: 8, 512>}, {pipeline_mode = #tpu.pipeline_mode<synchronous>, transform_indices = @transform_1, window_bounds = array<i64: 200, 17>}, {transform_indices = @transform_2, window_bounds = array<i64: 8, 512>}]} {
    %0 = tpu.iota {dimensions = array<i32: 1>} : vector<1x512xi32>
    %c255_i32 = arith.constant 255 : i32
    %1 = vector.broadcast %c255_i32 : i32 to vector<1x512xi32>
    %2 = arith.andi %0, %1 : vector<1x512xi32>
    %c4_i32 = arith.constant 4 : i32
    %3 = vector.broadcast %c4_i32 : i32 to vector<1x512xi32>
    %4 = arith.shrsi %2, %3 : vector<1x512xi32>
    %c15_i32 = arith.constant 15 : i32
    %5 = vector.broadcast %c15_i32 : i32 to vector<1x512xi32>
    %6 = arith.andi %2, %5 : vector<1x512xi32>
    %c14_i32 = arith.constant 14 : i32
    %7 = vector.broadcast %c14_i32 : i32 to vector<1x512xi32>
    %8 = arith.cmpi slt, %4, %7 : vector<1x512xi32>
    %c2_i32 = arith.constant 2 : i32
    %9 = vector.broadcast %c2_i32 : i32 to vector<1x512xi32>
    %10 = arith.cmpi sge, %4, %9 : vector<1x512xi32>
    %c14_i32_0 = arith.constant 14 : i32
    %11 = vector.broadcast %c14_i32_0 : i32 to vector<1x512xi32>
    %12 = arith.cmpi slt, %6, %11 : vector<1x512xi32>
    %c2_i32_1 = arith.constant 2 : i32
    %13 = vector.broadcast %c2_i32_1 : i32 to vector<1x512xi32>
    %14 = arith.cmpi sge, %6, %13 : vector<1x512xi32>
    %c0 = arith.constant 0 : index
    %c0_2 = arith.constant 0 : index
    %15 = vector.load %arg2[%c0, %c0_2] : memref<200x17xf32, #tpu.memory_space<vmem>>, vector<16x8xf32>
    %c0_3 = arith.constant 0 : index
    %c16 = arith.constant 16 : index
    %16 = vector.load %arg2[%c0_3, %c16] : memref<200x17xf32, #tpu.memory_space<vmem>>, vector<16x1xf32>
    %c16_4 = arith.constant 16 : index
    %c0_5 = arith.constant 0 : index
    %17 = vector.load %arg2[%c16_4, %c0_5] : memref<200x17xf32, #tpu.memory_space<vmem>>, vector<16x16xf32>
    %c16_6 = arith.constant 16 : index
    %c16_7 = arith.constant 16 : index
    %18 = vector.load %arg2[%c16_6, %c16_7] : memref<200x17xf32, #tpu.memory_space<vmem>>, vector<16x1xf32>
    %c32 = arith.constant 32 : index
    %c16_8 = arith.constant 16 : index
    %19 = vector.load %arg2[%c32, %c16_8] : memref<200x17xf32, #tpu.memory_space<vmem>>, vector<16x1xf32>
    %c176 = arith.constant 176 : index
    %c0_9 = arith.constant 0 : index
    %20 = vector.load %arg2[%c176, %c0_9] : memref<200x17xf32, #tpu.memory_space<vmem>>, vector<16x16xf32>
    %c176_10 = arith.constant 176 : index
    %c16_11 = arith.constant 16 : index
    %21 = vector.load %arg2[%c176_10, %c16_11] : memref<200x17xf32, #tpu.memory_space<vmem>>, vector<16x1xf32>
    %c192 = arith.constant 192 : index
    %c0_12 = arith.constant 0 : index
    %22 = vector.load %arg2[%c192, %c0_12] : memref<200x17xf32, #tpu.memory_space<vmem>>, vector<8x16xf32>
    %c192_13 = arith.constant 192 : index
    %c16_14 = arith.constant 16 : index
    %23 = vector.load %arg2[%c192_13, %c16_14] : memref<200x17xf32, #tpu.memory_space<vmem>>, vector<8x1xf32>
    %c0_15 = arith.constant 0 : index
    %c0_16 = arith.constant 0 : index
    %24 = vector.load %arg1[%c0_15, %c0_16] : memref<8x512xf32, #tpu.memory_space<vmem>>, vector<8x512xf32>
    %cst = arith.constant dense<0.000000e+00> : vector<16x512xf32>
    %25 = tpu.matmul %15, %24, %cst {dimension_numbers = #tpu.dot_dimension_numbers<[1], [0], [0], [1], [0, 0, 1, 1], [], []>} : vector<16x8xf32>, vector<8x512xf32>, vector<16x512xf32> -> vector<16x512xf32>
    %26 = vector.broadcast %16 : vector<16x1xf32> to vector<16x512xf32>
    %27 = arith.addf %25, %26 : vector<16x512xf32>
    %cst_17 = arith.constant 0.000000e+00 : f32
    %28 = vector.broadcast %cst_17 : f32 to vector<16x512xf32>
    %29 = arith.maximumf %27, %28 : vector<16x512xf32>
    %cst_18 = arith.constant dense<0.000000e+00> : vector<16x512xf32>
    %30 = tpu.matmul %17, %29, %cst_18 {dimension_numbers = #tpu.dot_dimension_numbers<[1], [0], [0], [1], [0, 0, 1, 1], [], []>} : vector<16x16xf32>, vector<16x512xf32>, vector<16x512xf32> -> vector<16x512xf32>
    %31 = vector.broadcast %18 : vector<16x1xf32> to vector<16x512xf32>
    %32 = arith.addf %30, %31 : vector<16x512xf32>
    %cst_19 = arith.constant 0.000000e+00 : f32
    %33 = vector.broadcast %cst_19 : f32 to vector<16x512xf32>
    %34 = arith.maximumf %32, %33 : vector<16x512xf32>
    %c34_i32 = arith.constant 34 : i32
    %35 = tpu.dynamic_rotate %34 by %c34_i32 dim 1 : vector<16x512xf32>, i32 -> vector<16x512xf32>
    %36 = arith.andi %10, %14 : vector<1x512xi1>
    %cst_20 = arith.constant 0.000000e+00 : f32
    %37 = vector.shape_cast %36 : vector<1x512xi1> to vector<1x512xi1>
    %38 = vector.broadcast %37 : vector<1x512xi1> to vector<16x512xi1>
    %39 = vector.broadcast %cst_20 : f32 to vector<16x512xf32>
    %40 = arith.select %38, %35, %39 : vector<16x512xi1>, vector<16x512xf32>
    %c32_21 = arith.constant 32 : index
    %c0_22 = arith.constant 0 : index
    %41 = vector.load %arg2[%c32_21, %c0_22] : memref<200x17xf32, #tpu.memory_space<vmem>>, vector<16x16xf32>
    %cst_23 = arith.constant dense<0.000000e+00> : vector<16x512xf32>
    %42 = tpu.matmul %41, %40, %cst_23 {dimension_numbers = #tpu.dot_dimension_numbers<[1], [0], [0], [1], [0, 0, 1, 1], [], []>} : vector<16x16xf32>, vector<16x512xf32>, vector<16x512xf32> -> vector<16x512xf32>
    %c32_i32 = arith.constant 32 : i32
    %43 = tpu.dynamic_rotate %34 by %c32_i32 dim 1 : vector<16x512xf32>, i32 -> vector<16x512xf32>
    %cst_24 = arith.constant 0.000000e+00 : f32
    %44 = vector.shape_cast %10 : vector<1x512xi1> to vector<1x512xi1>
    %45 = vector.broadcast %44 : vector<1x512xi1> to vector<16x512xi1>
    %46 = vector.broadcast %cst_24 : f32 to vector<16x512xf32>
    %47 = arith.select %45, %43, %46 : vector<16x512xi1>, vector<16x512xf32>
    %c48 = arith.constant 48 : index
    %c0_25 = arith.constant 0 : index
    %48 = vector.load %arg2[%c48, %c0_25] : memref<200x17xf32, #tpu.memory_space<vmem>>, vector<16x16xf32>
    %cst_26 = arith.constant dense<0.000000e+00> : vector<16x512xf32>
    %49 = tpu.matmul %48, %47, %cst_26 {dimension_numbers = #tpu.dot_dimension_numbers<[1], [0], [0], [1], [0, 0, 1, 1], [], []>} : vector<16x16xf32>, vector<16x512xf32>, vector<16x512xf32> -> vector<16x512xf32>
    %50 = arith.addf %42, %49 : vector<16x512xf32>
    %c30_i32 = arith.constant 30 : i32
    %51 = tpu.dynamic_rotate %34 by %c30_i32 dim 1 : vector<16x512xf32>, i32 -> vector<16x512xf32>
    %52 = arith.andi %10, %12 : vector<1x512xi1>
    %cst_27 = arith.constant 0.000000e+00 : f32
    %53 = vector.shape_cast %52 : vector<1x512xi1> to vector<1x512xi1>
    %54 = vector.broadcast %53 : vector<1x512xi1> to vector<16x512xi1>
    %55 = vector.broadcast %cst_27 : f32 to vector<16x512xf32>
    %56 = arith.select %54, %51, %55 : vector<16x512xi1>, vector<16x512xf32>
    %c64 = arith.constant 64 : index
    %c0_28 = arith.constant 0 : index
    %57 = vector.load %arg2[%c64, %c0_28] : memref<200x17xf32, #tpu.memory_space<vmem>>, vector<16x16xf32>
    %cst_29 = arith.constant dense<0.000000e+00> : vector<16x512xf32>
    %58 = tpu.matmul %57, %56, %cst_29 {dimension_numbers = #tpu.dot_dimension_numbers<[1], [0], [0], [1], [0, 0, 1, 1], [], []>} : vector<16x16xf32>, vector<16x512xf32>, vector<16x512xf32> -> vector<16x512xf32>
    %59 = arith.addf %50, %58 : vector<16x512xf32>
    %c2_i32_30 = arith.constant 2 : i32
    %60 = tpu.dynamic_rotate %34 by %c2_i32_30 dim 1 : vector<16x512xf32>, i32 -> vector<16x512xf32>
    %cst_31 = arith.constant 0.000000e+00 : f32
    %61 = vector.shape_cast %14 : vector<1x512xi1> to vector<1x512xi1>
    %62 = vector.broadcast %61 : vector<1x512xi1> to vector<16x512xi1>
    %63 = vector.broadcast %cst_31 : f32 to vector<16x512xf32>
    %64 = arith.select %62, %60, %63 : vector<16x512xi1>, vector<16x512xf32>
    %c80 = arith.constant 80 : index
    %c0_32 = arith.constant 0 : index
    %65 = vector.load %arg2[%c80, %c0_32] : memref<200x17xf32, #tpu.memory_space<vmem>>, vector<16x16xf32>
    %cst_33 = arith.constant dense<0.000000e+00> : vector<16x512xf32>
    %66 = tpu.matmul %65, %64, %cst_33 {dimension_numbers = #tpu.dot_dimension_numbers<[1], [0], [0], [1], [0, 0, 1, 1], [], []>} : vector<16x16xf32>, vector<16x512xf32>, vector<16x512xf32> -> vector<16x512xf32>
    %67 = arith.addf %59, %66 : vector<16x512xf32>
    %c96 = arith.constant 96 : index
    %c0_34 = arith.constant 0 : index
    %68 = vector.load %arg2[%c96, %c0_34] : memref<200x17xf32, #tpu.memory_space<vmem>>, vector<16x16xf32>
    %cst_35 = arith.constant dense<0.000000e+00> : vector<16x512xf32>
    %69 = tpu.matmul %68, %34, %cst_35 {dimension_numbers = #tpu.dot_dimension_numbers<[1], [0], [0], [1], [0, 0, 1, 1], [], []>} : vector<16x16xf32>, vector<16x512xf32>, vector<16x512xf32> -> vector<16x512xf32>
    %70 = arith.addf %67, %69 : vector<16x512xf32>
    %c510_i32 = arith.constant 510 : i32
    %71 = tpu.dynamic_rotate %34 by %c510_i32 dim 1 : vector<16x512xf32>, i32 -> vector<16x512xf32>
    %cst_36 = arith.constant 0.000000e+00 : f32
    %72 = vector.shape_cast %12 : vector<1x512xi1> to vector<1x512xi1>
    %73 = vector.broadcast %72 : vector<1x512xi1> to vector<16x512xi1>
    %74 = vector.broadcast %cst_36 : f32 to vector<16x512xf32>
    %75 = arith.select %73, %71, %74 : vector<16x512xi1>, vector<16x512xf32>
    %c112 = arith.constant 112 : index
    %c0_37 = arith.constant 0 : index
    %76 = vector.load %arg2[%c112, %c0_37] : memref<200x17xf32, #tpu.memory_space<vmem>>, vector<16x16xf32>
    %cst_38 = arith.constant dense<0.000000e+00> : vector<16x512xf32>
    %77 = tpu.matmul %76, %75, %cst_38 {dimension_numbers = #tpu.dot_dimension_numbers<[1], [0], [0], [1], [0, 0, 1, 1], [], []>} : vector<16x16xf32>, vector<16x512xf32>, vector<16x512xf32> -> vector<16x512xf32>
    %78 = arith.addf %70, %77 : vector<16x512xf32>
    %c482_i32 = arith.constant 482 : i32
    %79 = tpu.dynamic_rotate %34 by %c482_i32 dim 1 : vector<16x512xf32>, i32 -> vector<16x512xf32>
    %80 = arith.andi %8, %14 : vector<1x512xi1>
    %cst_39 = arith.constant 0.000000e+00 : f32
    %81 = vector.shape_cast %80 : vector<1x512xi1> to vector<1x512xi1>
    %82 = vector.broadcast %81 : vector<1x512xi1> to vector<16x512xi1>
    %83 = vector.broadcast %cst_39 : f32 to vector<16x512xf32>
    %84 = arith.select %82, %79, %83 : vector<16x512xi1>, vector<16x512xf32>
    %c128 = arith.constant 128 : index
    %c0_40 = arith.constant 0 : index
    %85 = vector.load %arg2[%c128, %c0_40] : memref<200x17xf32, #tpu.memory_space<vmem>>, vector<16x16xf32>
    %cst_41 = arith.constant dense<0.000000e+00> : vector<16x512xf32>
    %86 = tpu.matmul %85, %84, %cst_41 {dimension_numbers = #tpu.dot_dimension_numbers<[1], [0], [0], [1], [0, 0, 1, 1], [], []>} : vector<16x16xf32>, vector<16x512xf32>, vector<16x512xf32> -> vector<16x512xf32>
    %87 = arith.addf %78, %86 : vector<16x512xf32>
    %c480_i32 = arith.constant 480 : i32
    %88 = tpu.dynamic_rotate %34 by %c480_i32 dim 1 : vector<16x512xf32>, i32 -> vector<16x512xf32>
    %cst_42 = arith.constant 0.000000e+00 : f32
    %89 = vector.shape_cast %8 : vector<1x512xi1> to vector<1x512xi1>
    %90 = vector.broadcast %89 : vector<1x512xi1> to vector<16x512xi1>
    %91 = vector.broadcast %cst_42 : f32 to vector<16x512xf32>
    %92 = arith.select %90, %88, %91 : vector<16x512xi1>, vector<16x512xf32>
    %c144 = arith.constant 144 : index
    %c0_43 = arith.constant 0 : index
    %93 = vector.load %arg2[%c144, %c0_43] : memref<200x17xf32, #tpu.memory_space<vmem>>, vector<16x16xf32>
    %cst_44 = arith.constant dense<0.000000e+00> : vector<16x512xf32>
    %94 = tpu.matmul %93, %92, %cst_44 {dimension_numbers = #tpu.dot_dimension_numbers<[1], [0], [0], [1], [0, 0, 1, 1], [], []>} : vector<16x16xf32>, vector<16x512xf32>, vector<16x512xf32> -> vector<16x512xf32>
    %95 = arith.addf %87, %94 : vector<16x512xf32>
    %c478_i32 = arith.constant 478 : i32
    %96 = tpu.dynamic_rotate %34 by %c478_i32 dim 1 : vector<16x512xf32>, i32 -> vector<16x512xf32>
    %97 = arith.andi %8, %12 : vector<1x512xi1>
    %cst_45 = arith.constant 0.000000e+00 : f32
    %98 = vector.shape_cast %97 : vector<1x512xi1> to vector<1x512xi1>
    %99 = vector.broadcast %98 : vector<1x512xi1> to vector<16x512xi1>
    %100 = vector.broadcast %cst_45 : f32 to vector<16x512xf32>
    %101 = arith.select %99, %96, %100 : vector<16x512xi1>, vector<16x512xf32>
    %c160 = arith.constant 160 : index
    %c0_46 = arith.constant 0 : index
    %102 = vector.load %arg2[%c160, %c0_46] : memref<200x17xf32, #tpu.memory_space<vmem>>, vector<16x16xf32>
    %cst_47 = arith.constant dense<0.000000e+00> : vector<16x512xf32>
    %103 = tpu.matmul %102, %101, %cst_47 {dimension_numbers = #tpu.dot_dimension_numbers<[1], [0], [0], [1], [0, 0, 1, 1], [], []>} : vector<16x16xf32>, vector<16x512xf32>, vector<16x512xf32> -> vector<16x512xf32>
    %104 = arith.addf %95, %103 : vector<16x512xf32>
    %105 = vector.broadcast %19 : vector<16x1xf32> to vector<16x512xf32>
    %106 = arith.addf %104, %105 : vector<16x512xf32>
    %cst_48 = arith.constant 0.000000e+00 : f32
    %107 = vector.broadcast %cst_48 : f32 to vector<16x512xf32>
    %108 = arith.maximumf %106, %107 : vector<16x512xf32>
    %cst_49 = arith.constant dense<0.000000e+00> : vector<16x512xf32>
    %109 = tpu.matmul %20, %108, %cst_49 {dimension_numbers = #tpu.dot_dimension_numbers<[1], [0], [0], [1], [0, 0, 1, 1], [], []>} : vector<16x16xf32>, vector<16x512xf32>, vector<16x512xf32> -> vector<16x512xf32>
    %110 = vector.broadcast %21 : vector<16x1xf32> to vector<16x512xf32>
    %111 = arith.addf %109, %110 : vector<16x512xf32>
    %cst_50 = arith.constant 0.000000e+00 : f32
    %112 = vector.broadcast %cst_50 : f32 to vector<16x512xf32>
    %113 = arith.maximumf %111, %112 : vector<16x512xf32>
    %cst_51 = arith.constant dense<0.000000e+00> : vector<8x512xf32>
    %114 = tpu.matmul %22, %113, %cst_51 {dimension_numbers = #tpu.dot_dimension_numbers<[1], [0], [0], [1], [0, 0, 1, 1], [], []>} : vector<8x16xf32>, vector<16x512xf32>, vector<8x512xf32> -> vector<8x512xf32>
    %115 = vector.broadcast %23 : vector<8x1xf32> to vector<8x512xf32>
    %116 = arith.addf %114, %115 : vector<8x512xf32>
    %117 = arith.addf %116, %24 : vector<8x512xf32>
    %cst_52 = arith.constant 0.000000e+00 : f32
    %118 = vector.broadcast %cst_52 : f32 to vector<8x512xf32>
    %119 = arith.maximumf %117, %118 : vector<8x512xf32>
    %c0_53 = arith.constant 0 : index
    %c0_54 = arith.constant 0 : index
    %120 = vector.load %arg3[%c0_53, %c0_54] : memref<8x512xf32, #tpu.memory_space<vmem>>, vector<8x512xf32>
    tpu.vector_store %arg3[%c0_53, %c0_54], %119 {strides = array<i32>} : memref<8x512xf32, #tpu.memory_space<vmem>>, vector<8x512xf32>,
    return
  }
  func.func @transform_0(%arg0: i32) -> (i32, i32) {
    %c0_i32 = arith.constant 0 : i32
    %c0_i32_0 = arith.constant 0 : i32
    return %c0_i32, %arg0 : i32, i32
  }
  func.func @transform_1(%arg0: i32) -> (i32, i32) {
    %c0_i32 = arith.constant 0 : i32
    %c0_i32_0 = arith.constant 0 : i32
    %c0_i32_1 = arith.constant 0 : i32
    return %c0_i32, %c0_i32_0 : i32, i32
  }
  func.func @transform_2(%arg0: i32) -> (i32, i32) {
    %c0_i32 = arith.constant 0 : i32
    %c0_i32_0 = arith.constant 0 : i32
    return %c0_i32, %arg0 : i32, i32
  }
}

</mosaic_0001>

<bundles_post_ra>
// kernel: tpu_custom_call.1
= control target key start
LH: loop header
LB: loop body
LE: loop exit
PB: predicated region body
PF: predicated region fallthrough
CT: control target
= control target key end

     0   :  { %vm68_vm0 = vcmask 64512   ;;  %v3150_v5 = vmov 0.0   ;;  %s3863_s0 = inlined_call_operand.vmem [shape: f32[8,512], index: 0, kind: input, shape index: {}]   ;;  %s3864_s1 = inlined_call_operand.vmem [shape: f32[200,17], index: 1, kind: input, shape index: {}]   ;;  %s3865_s2 = inlined_call_operand.hbm [shape: f32[8,512], index: 2, kind: output, shape index: {}]  }
   0x1   :  { %v55_v0 = vld [vmem:[%s3863_s0 + $0x8] sm:$0xff]  ;;  %v57_v1 = vld [vmem:[%s3863_s0 + $0x18] sm:$0xff]  ;;  %v54_v2 = vld [vmem:[%s3863_s0] sm:$0xff]  ;;  %137 = vmatprep.mubr.f32.mxu0 %v3150_v5 }
   0x2   :  { %73 = vmatprep.subr.mxu0 %v55_v0  ;;  %150 = vmatprep.subr.mxu1 %v57_v1  ;;  %v56_v3 = vld [vmem:[%s3863_s0 + $0x10] sm:$0xff]  ;;  %v45_v4 = vld [vmem:[%s3864_s1] sm:$0xff] }
   0x3   :  { %74 = vmatpush1.msra.mxu0 %v54_v2 }
   0x4   :  { %7 = vsyncpa [#allocation3], 0  ;;  %151 = vmatpush1.msra.mxu1 %v56_v3  ;;  %214 = vmatprep.mubr.f32.mxu1 %v3150_v5  ;;  %v46_v6 = vld [vmem:[%s3864_s1 + $0x8] sm:$0xff]  ;;  %v3151_v7 = vmov 16   ;;  %v47_v8 = vld [vmem:[%s3864_s1 + $0x10] sm:$0xff]  ;;  %vm245_vm1 = vcmask 130048  }
   0x5   :  { %2643 = vmatmul.mubr.msk.f32.vlgmr.msra.gmra.mrb[0].mxu0 %vm68_vm0, %v45_v4  ;;  %2645 = vmatmul.mubr.msk.f32.vlgmr.msra.gmra.mrb[0].mxu1 %vm68_vm0, %v45_v4  ;;  %v48_v9 = vld [vmem:[%s3864_s1 + $0x18] sm:$0xff]  ;;  %s3152_s25 = smov 32   ;;  %s3153_s26 = smov 34  }
   0x6   :  { %143 = vmatprep.mubr.f32.mxu0 %v3150_v5  ;;  %220 = vmatprep.mubr.f32.mxu1 %v3150_v5  ;;  %s3154_s27 = smov 30   ;;  %s3155_s28 = smov 2  }
   0x7   :  { %2960 = vset.pattern.permute.xlu0 %v3151_v7  ;;  %2961 = vset.pattern.permute.xlu1 %v3151_v7  ;;  %s3156_s29 = smov 126   ;;  %s3157_s30 = smov 98  }
   0x8   :  { %60 = vperm.xlu0 %2960, %v45_v4   ;;  %237 = vperm.xlu1 %2961, %v47_v8   ;;  %s3158_s3 = smov 96   ;;  %s3159_s4 = smov 94  }
   0x9   :  { %2644 = vmatmul.mubr.msk.f32.gmra.mrb[2].mxu0 %vm68_vm0, %v46_v6  ;;  %2646 = vmatmul.mubr.msk.f32.gmra.mrb[2].mxu1 %vm68_vm0, %v46_v6  ;;  %s3160_s24 = smov [#allocation2]  }
   0xa   :  { %314 = vmatprep.mubr.f32.mxu0 %v3150_v5  ;;  %391 = vmatprep.mubr.f32.mxu1 %v3150_v5 }
   0xc   :  { %65 = vperm.xlu0 %2960, %v46_v6   ;;  %242 = vperm.xlu1 %2961, %v48_v9  }
  0x87   :  { %v61_v10 = vpop.permute.xlu0 %60  ;;  %v238_v40 = vpop.permute.xlu1 %237 }
  0x8b   :  { %v66_v17 = vpop.permute.xlu0 %65  ;;  %v243_v47 = vpop.permute.xlu1 %242 }
  0xd8   :  { %v139_v11 = vpop.f32.mrb[0].mxu0  ;;  %v216_v12 = vpop.f32.mrb[0].mxu1 }
  0xd9   :  { %v141_v13 = vpop.f32.mrb[1].mxu0  ;;  %v218_v14 = vpop.f32.mrb[1].mxu1  ;;  %v140_v15 = vadd.f32 %v139_v11, %v61_v10  ;;  %v217_v16 = vadd.f32 %v216_v12, %v61_v10  ;;  %v3229_v11 = vld [vmem:[%s3864_s1 + $0x20] sm:$0xff]  ;;  %v3234_v12 = vld [vmem:[%s3864_s1 + $0x28] sm:$0xff] }
  0xda   :  { %v142_v18 = vadd.f32 %v141_v13, %v61_v10  ;;  %v219_v19 = vadd.f32 %v218_v14, %v61_v10  ;;  %v3241_v13 = vld [vmem:[%s3864_s1 + $0xb0] sm:$0xff]  ;;  %v3246_v14 = vld [vmem:[%s3864_s1 + $0xb8] sm:$0xff] }
  0xdb   :  { %v227_v28 = vmax.f32 %v140_v15, 0.0  ;;  %v229_v29 = vmax.f32 %v217_v16, 0.0  ;;  %v3253_v15 = vld [vmem:[%s3864_s1 + $0xc0] sm:$0xff]  ;;  %v12_v16 = vlaneseq }
  0xdc   :  { %v145_v20 = vpop.f32.mrb[2].mxu0  ;;  %v222_v21 = vpop.f32.mrb[2].mxu1  ;;  %v228_v32 = vmax.f32 %v142_v18, 0.0  ;;  %v230_v33 = vmax.f32 %v219_v19, 0.0 }
  0xdd   :  { %v146_v22 = vadd.f32 %v145_v20, %v66_v17  ;;  %v223_v23 = vadd.f32 %v222_v21, %v66_v17  ;;  %v147_v24 = vpop.f32.mrb[3].mxu0  ;;  %v224_v25 = vpop.f32.mrb[3].mxu1 }
  0xde   :  { %v148_v26 = vadd.f32 %v147_v24, %v66_v17  ;;  %v225_v27 = vadd.f32 %v224_v25, %v66_v17  ;;  %v3256_v17 = vand.u32 127, %v12_v16 }
  0xdf   :  { %v231_v30 = vmax.f32 %v146_v22, 0.0  ;;  %v233_v31 = vmax.f32 %v223_v23, 0.0 }
  0xe0   :  { %v232_v34 = vmax.f32 %v148_v26, 0.0  ;;  %v234_v35 = vmax.f32 %v225_v27, 0.0  ;;  %v14_v18 = vadd.s32 128, %v3256_v17  ;;  %v16_v20 = vadd.s32 384, %v3256_v17 }
  0xe1   :  { %v2759_v36 = vpack.c.bf16 %v231_v30, %v227_v28  ;;  %v2763_v37 = vpack.c.bf16 %v233_v31, %v229_v29  ;;  %v15_v21 = vadd.s32 256, %v3256_v17  ;;  %v17_v22 = vand.u32 255, %v3256_v17 }
  0xe2   :  { %v2757_v38 = vpack.c.bf16 %v232_v34, %v228_v32  ;;  %v2761_v39 = vpack.c.bf16 %v234_v35, %v230_v33  ;;  %v18_v19 = vand.u32 255, %v14_v18  ;;  %v20_v24 = vand.u32 255, %v16_v20 }
  0xe3   :  { %v19_v25 = vand.u32 255, %v15_v21  ;;  %vm473_vm2 = vcmp.lt.s32.totalorder %v3256_v17, 32  ;;  %v3267_v28 = vshra.s32 %v17_v22, 4  ;;  %vm428_vm8 = vcmp.lt.s32.totalorder %v3256_v17, 34 }
  0xe4   :  { %2758 = vmatprep.subr.bf16.mxu0 %v2757_v38  ;;  %2762 = vmatprep.subr.bf16.mxu1 %v2761_v39  ;;  %v3262_v23 = vshra.s32 %v18_v19, 4  ;;  %v3264_v26 = vand.u32 15, %v18_v19  ;;  %v3270_v32 = vshra.s32 %v20_v24, 4 }
  0xe5   :  { %2760 = vmatpush1.bf16.msra.mxu0 %v2759_v36  ;;  %2764 = vmatpush1.bf16.msra.mxu1 %v2763_v37  ;;  %v3272_v35 = vshra.s32 %v19_v25, 4  ;;  %v3275_v36 = vand.u32 15, %v17_v22  ;;  %vm33_vm6 = vcmp.ge.s32.totalorder %v3267_v28, 2 }
  0xe6   :  { %vm34_vm3 = vcmp.ge.s32.totalorder %v3262_v23, 2  ;;  %vm3869_vm4 = vcmp.ge.s32.totalorder %v3264_v26, 2  ;;  %vm36_vm7 = vcmp.ge.s32.totalorder %v3270_v32, 2  ;;  %vm3305_vm11 = vmpackc.low %vm33_vm6, %vm33_vm6 }
  0xe7   :  { %vm2766_vm5 = vmpackc.low %vm34_vm3, %vm34_vm3  ;;  %vm35_vm9 = vcmp.ge.s32.totalorder %v3272_v35, 2  ;;  %vm3866_vm12 = vcmp.ge.s32.totalorder %v3275_v36, 2 }
  0xe8   :  { %2647 = vmatmul.mubr.msk.f32.vlgmr.msra.gmra.mrb[4].mxu0 %vm245_vm1, %v47_v8  ;;  %2649 = vmatmul.mubr.msk.f32.vlgmr.msra.gmra.mrb[4].mxu1 %vm245_vm1, %v47_v8  ;;  %vm3294_vm10 = vmand %vm34_vm3, %vm3869_vm4  ;;  %vm37_vm4 = vcmp.lt.s32.totalorder %v3275_v36, 14 }
  0xe9   :  { %320 = vmatprep.mubr.f32.mxu0 %v3150_v5  ;;  %397 = vmatprep.mubr.f32.mxu1 %v3150_v5  ;;  %vm2772_vm13 = vmpackc.low %vm36_vm7, %vm36_vm7 }
  0xea   :  { %vm2775_vm15 = vmpackc.low %vm35_vm9, %vm35_vm9 }
  0xeb   :  { %vm3331_vm0 = vmand %vm33_vm6, %vm3866_vm12  ;;  %vm836_vm12 = vcmp.lt.s32.totalorder %v3256_v17, 30 }
  0xec   :  { %2648 = vmatmul.mubr.msk.f32.gmra.mrb[6].mxu0 %vm245_vm1, %v48_v9  ;;  %2650 = vmatmul.mubr.msk.f32.gmra.mrb[6].mxu1 %vm245_vm1, %v48_v9 }
  0xed   :  { %570 = vmatprep.mubr.f32.mxu0 %v3150_v5  ;;  %647 = vmatprep.mubr.f32.mxu1 %v3150_v5 }
 0x1bb   :  { %v316_v41 = vpop.f32.mrb[4].mxu0  ;;  %v393_v42 = vpop.f32.mrb[4].mxu1 }
 0x1bc   :  { %v318_v43 = vpop.f32.mrb[5].mxu0  ;;  %v395_v44 = vpop.f32.mrb[5].mxu1  ;;  %v317_v45 = vadd.f32 %v316_v41, %v238_v40  ;;  %v394_v46 = vadd.f32 %v393_v42, %v238_v40 }
 0x1bd   :  { %v319_v48 = vadd.f32 %v318_v43, %v238_v40  ;;  %v396_v49 = vadd.f32 %v395_v44, %v238_v40  ;;  %v3285_v40 = vand.u32 15, %v20_v24 }
 0x1be   :  { %v404_v58 = vmax.f32 %v317_v45, 0.0  ;;  %v406_v59 = vmax.f32 %v394_v46, 0.0 }
 0x1bf   :  { %v322_v50 = vpop.f32.mrb[6].mxu0  ;;  %v399_v51 = vpop.f32.mrb[6].mxu1  ;;  %v405_v62 = vmax.f32 %v319_v48, 0.0  ;;  %v407_v63 = vmax.f32 %v396_v49, 0.0  ;;  %vm3867_vm14 = vcmp.ge.s32.totalorder %v3285_v40, 2 }
 0x1c0   :  { %v323_v52 = vadd.f32 %v322_v50, %v243_v47  ;;  %v400_v53 = vadd.f32 %v399_v51, %v243_v47  ;;  %v324_v54 = vpop.f32.mrb[7].mxu0  ;;  %v401_v55 = vpop.f32.mrb[7].mxu1  ;;  %v3310_v51 = vand.u32 15, %v19_v25 }
 0x1c1   :  { %v325_v56 = vadd.f32 %v324_v54, %v243_v47  ;;  %v402_v57 = vadd.f32 %v401_v55, %v243_v47 }
 0x1c2   :  { %v408_v60 = vmax.f32 %v323_v52, 0.0  ;;  %v410_v61 = vmax.f32 %v400_v53, 0.0 }
 0x1c3   :  { %v409_v0 = vmax.f32 %v325_v56, 0.0  ;;  %v411_v1 = vmax.f32 %v402_v57, 0.0 }
 0x1c4   :  { %v2962_v2 = vpack.i.bf16 %v408_v60, %v404_v58  ;;  %v2967_v3 = vpack.i.bf16 %v410_v61, %v406_v59  ;;  %v3222_v9 = vpack.c.bf16 %v408_v60, %v404_v58  ;;  %v3224_v10 = vpack.c.bf16 %v410_v61, %v406_v59 }
 0x1c5   :  { %v3002_v4 = vpack.i.bf16 %v409_v0, %v405_v62  ;;  %v3007_v6 = vpack.i.bf16 %v411_v1, %v407_v63  ;;  %v3218_v7 = vpack.c.bf16 %v409_v0, %v405_v62  ;;  %v3220_v8 = vpack.c.bf16 %v411_v1, %v407_v63 }
 0x1c6   :  { %2963 = vrot.lane.b32.xlu0 %v2962_v2, %s3152_s25 }
 0x1c7   :  { %3003 = vrot.lane.b32.xlu1 %v3002_v4, %s3152_s25 }
 0x1ca   :  { %2968 = vrot.lane.b32.xlu0 %v2967_v3, %s3152_s25 }
 0x1cb   :  { %3008 = vrot.lane.b32.xlu1 %v3007_v6, %s3152_s25  ;;  %s2635_s25 = sshll.u32 %s3160_s24, 4  ;;  %s2636_s25 = int_to_ptr.vmem [resolvable:$true] %s2635_s25 }
 0x1cc   :  { %p3131_p1 = scmp.lt.s32.totalorder %s2636_s25, %s2636_s25 }
 0x1ce   :  { %2973 = vrot.lane.b32.xlu0 %v2962_v2, %s3153_s26 }
 0x1cf   :  { %3013 = vrot.lane.b32.xlu1 %v3002_v4, %s3153_s26 }
 0x1d2   :  { %2978 = vrot.lane.b32.xlu0 %v2967_v3, %s3153_s26 }
 0x1d3   :  { %3018 = vrot.lane.b32.xlu1 %v3007_v6, %s3153_s26 }
 0x1d6   :  { %2983 = vrot.lane.b32.xlu0 %v2962_v2, %s3154_s27 }
 0x1d7   :  { %3023 = vrot.lane.b32.xlu1 %v3002_v4, %s3154_s27 }
 0x1da   :  { %2988 = vrot.lane.b32.xlu0 %v2967_v3, %s3154_s27 }
 0x1db   :  { %3028 = vrot.lane.b32.xlu1 %v3007_v6, %s3154_s27 }
 0x1de   :  { %2993 = vrot.lane.b32.xlu0 %v2962_v2, %s3155_s28 }
 0x1df   :  { %3033 = vrot.lane.b32.xlu1 %v3002_v4, %s3155_s28 }
 0x1e2   :  { %2998 = vrot.lane.b32.xlu0 %v2967_v3, %s3155_s28 }
 0x1e3   :  { %3038 = vrot.lane.b32.xlu1 %v3007_v6, %s3155_s28  ;;  %s3126_s28 = scalar_lea.vmem %s2636_s25, 512 }
 0x1e4   :  { %p3127_p0 = scmp.ne.s32.totalorder %s2636_s25, %s3126_s28  ;;  %p3132_p2 = scmp.lt.s32.totalorder %s3126_s28, %s3126_s28 }
 0x1e6   :  { %3043 = vrot.lane.b32.xlu0 %v2962_v2, %s3156_s29  ;;  %p3133_p3 = por %p3132_p2, %p3131_p1 }
 0x1e7   :  { %3083 = vrot.lane.b32.xlu1 %v3002_v4, %s3156_s29 }
 0x1e8   :  { %p3134_p4 = pnand %p3133_p3, %p3127_p0 }
 0x1ea   :  { %3048 = vrot.lane.b32.xlu0 %v2967_v3, %s3156_s29 }
 0x1eb   :  { %3088 = vrot.lane.b32.xlu1 %v3007_v6, %s3156_s29 }
 0x1ee   :  { %3053 = vrot.lane.b32.xlu0 %v2962_v2, %s3157_s30 }
 0x1ef   :  { %3093 = vrot.lane.b32.xlu1 %v3002_v4, %s3157_s30 }
 0x1f2   :  { %3058 = vrot.lane.b32.xlu0 %v2967_v3, %s3157_s30 }
 0x1f3   :  { %3098 = vrot.lane.b32.xlu1 %v3007_v6, %s3157_s30 }
 0x1f6   :  { %3063 = vrot.lane.b32.xlu0 %v2962_v2, %s3158_s3 }
 0x1f7   :  { %3103 = vrot.lane.b32.xlu1 %v3002_v4, %s3158_s3 }
 0x1fa   :  { %3068 = vrot.lane.b32.xlu0 %v2967_v3, %s3158_s3 }
 0x1fb   :  { %3108 = vrot.lane.b32.xlu1 %v3007_v6, %s3158_s3 }
 0x1fe   :  { %3073 = vrot.lane.b32.xlu0 %v2962_v2, %s3159_s4 }
 0x1ff   :  { %3113 = vrot.lane.b32.xlu1 %v3002_v4, %s3159_s4 }
 0x202   :  { %3078 = vrot.lane.b32.xlu0 %v2967_v3, %s3159_s4 }
 0x203   :  { %3118 = vrot.lane.b32.xlu1 %v3007_v6, %s3159_s4  ;;  %v498_v6 = vld [vmem:[%s3864_s1 + $0x30] sm:$0xff] }
 0x206   :  { %2269 = vperm.xlu0 %2960, %v3229_v11  }
 0x207   :  { %2273 = vperm.xlu1 %2961, %v3234_v12  }
 0x20a   :  { %2294 = vperm.xlu0 %2960, %v3241_v13  }
 0x20b   :  { %2299 = vperm.xlu1 %2961, %v3246_v14  }
 0x20e   :  { %2470 = vperm.xlu0 %2960, %v3253_v15  }
 0x238   :  { %v2964_v27 = vpop.permute.xlu0 %2963 }
 0x239   :  { %v2966_v29 = vunpack.i.h.bf16 %v2964_v27  ;;  %v2965_v30 = vunpack.i.l.bf16 %v2964_v27  ;;  %v3004_v31 = vpop.permute.xlu1 %3003 }
 0x23a   :  { %v3006_v33 = vunpack.i.h.bf16 %v3004_v31  ;;  %v3005_v34 = vunpack.i.l.bf16 %v3004_v31 }
 0x23c   :  { %v478_v37 = vsel %vm473_vm2, %v2965_v30, %v3005_v34  ;;  %v479_v38 = vsel %vm473_vm2, %v2966_v29, %v3006_v33  ;;  %v2969_v39 = vpop.permute.xlu0 %2968 }
 0x23d   :  { %v2765_v41 = vpack.c.bf16 %v479_v38, %v478_v37  ;;  %v2971_v42 = vunpack.i.h.bf16 %v2969_v39  ;;  %v2970_v43 = vunpack.i.l.bf16 %v2969_v39  ;;  %v3009_v44 = vpop.permute.xlu1 %3008  ;;  %v499_v37 = vld [vmem:[%s3864_s1 + $0x38] sm:$0xff] }
 0x23e   :  { %v3011_v45 = vunpack.i.h.bf16 %v3009_v44  ;;  %v3010_v46 = vunpack.i.l.bf16 %v3009_v44 }
 0x23f   :  { %v476_v48 = vsel %vm473_vm2, %v3005_v34, %v2970_v43  ;;  %v477_v49 = vsel %vm473_vm2, %v3006_v33, %v2971_v42  ;;  %2767 = vmatprep.subr.msk.bf16.mxu0 %vm2766_vm5, %v2765_v41  ;;  %vm3868_vm5 = vcmp.ge.s32.totalorder %v3310_v51, 2 }
 0x240   :  { %v474_v52 = vsel %vm473_vm2, %v2970_v43, %v3010_v46  ;;  %v475_v53 = vsel %vm473_vm2, %v2971_v42, %v3011_v45  ;;  %v480_v54 = vsel %vm473_vm2, %v3010_v46, %v2965_v30  ;;  %v2974_v55 = vpop.permute.xlu0 %2973  ;;  %v481_v56 = vsel %vm473_vm2, %v3011_v45, %v2966_v29  ;;  %vm2778_vm2 = vmpackc.low %vm3294_vm10, %vm3294_vm10 }
 0x241   :  { %v2771_v57 = vpack.c.bf16 %v475_v53, %v474_v52  ;;  %v2976_v58 = vunpack.i.h.bf16 %v2974_v55  ;;  %v2975_v59 = vunpack.i.l.bf16 %v2974_v55  ;;  %v3014_v60 = vpop.permute.xlu1 %3013  ;;  %v2774_v61 = vpack.c.bf16 %v477_v49, %v476_v48 }
 0x242   :  { %v2768_v62 = vpack.c.bf16 %v481_v56, %v480_v54  ;;  %v3016_v63 = vunpack.i.h.bf16 %v3014_v60  ;;  %v3015_v0 = vunpack.i.l.bf16 %v3014_v60 }
 0x243   :  { %2773 = vmatprep.subr.msk.bf16.mxu1 %vm2772_vm13, %v2771_v57  ;;  %vm2781_vm13 = vmpackc.low %vm3331_vm0, %vm3331_vm0 }
 0x244   :  { %v433_v2 = vsel %vm428_vm8, %v2975_v59, %v3015_v0  ;;  %v434_v3 = vsel %vm428_vm8, %v2976_v58, %v3016_v63  ;;  %2770 = vmatpush1.bf16.msk.msra.mxu0 %vm3305_vm11, %v2768_v62  ;;  %v2979_v4 = vpop.permute.xlu0 %2978  ;;  %2776 = vmatpush1.bf16.msk.msra.mxu1 %vm2775_vm15, %v2774_v61  ;;  %vm3352_vm11 = vmand %vm36_vm7, %vm3867_vm14  ;;  %vm3870_vm15 = vcmp.lt.s32.totalorder %v3264_v26, 14 }
 0x245   :  { %v2777_v16 = vpack.c.bf16 %v434_v3, %v433_v2  ;;  %v2981_v18 = vunpack.i.h.bf16 %v2979_v4  ;;  %v2980_v19 = vunpack.i.l.bf16 %v2979_v4  ;;  %v3019_v20 = vpop.permute.xlu1 %3018  ;;  %vm3369_vm14 = vmand %vm35_vm9, %vm3868_vm5 }
 0x246   :  { %v3021_v22 = vunpack.i.h.bf16 %v3019_v20  ;;  %v3020_v24 = vunpack.i.l.bf16 %v3019_v20  ;;  %vm2784_vm5 = vmpackc.low %vm3352_vm11, %vm3352_vm11 }
 0x247   :  { %v431_v25 = vsel %vm428_vm8, %v3015_v0, %v2980_v19  ;;  %2655 = vmatmul.mubr.msk.f32.vlgmr.msra.gmra.mrb[8].mxu0 %vm245_vm1, %v498_v6  ;;  %2661 = vmatmul.mubr.msk.f32.vlgmr.msra.gmra.mrb[8].mxu1 %vm245_vm1, %v498_v6  ;;  %v432_v29 = vsel %vm428_vm8, %v3016_v63, %v2981_v18  ;;  %vm3400_vm10 = vmand %vm34_vm3, %vm3870_vm15  ;;  %vm39_vm15 = vcmp.lt.s32.totalorder %v3310_v51, 14 }
 0x248   :  { %v429_v30 = vsel %vm428_vm8, %v2980_v19, %v3020_v24  ;;  %v430_v31 = vsel %vm428_vm8, %v2981_v18, %v3021_v22  ;;  %v435_v33 = vsel %vm428_vm8, %v3020_v24, %v2975_v59  ;;  %2779 = vmatprep.subr.msk.bf16.mxu0 %vm2778_vm2, %v2777_v16  ;;  %v2984_v34 = vpop.permute.xlu0 %2983  ;;  %v436_v38 = vsel %vm428_vm8, %v3021_v22, %v2976_v58  ;;  %vm2787_vm8 = vmpackc.low %vm3369_vm14, %vm3369_vm14 }
 0x249   :  { %v2783_v39 = vpack.c.bf16 %v430_v31, %v429_v30  ;;  %v2986_v41 = vunpack.i.h.bf16 %v2984_v34  ;;  %v2985_v42 = vunpack.i.l.bf16 %v2984_v34  ;;  %v3024_v43 = vpop.permute.xlu1 %3023  ;;  %576 = vmatprep.mubr.f32.mxu0 %v3150_v5  ;;  %653 = vmatprep.mubr.f32.mxu1 %v3150_v5  ;;  %v2780_v45 = vpack.c.bf16 %v436_v38, %v435_v33  ;;  %vm2790_vm3 = vmpackc.low %vm3400_vm10, %vm3400_vm10 }
 0x24a   :  { %v3026_v46 = vunpack.i.h.bf16 %v3024_v43  ;;  %v3025_v47 = vunpack.i.l.bf16 %v3024_v43  ;;  %vm40_vm2 = vcmp.lt.s32.totalorder %v3285_v40, 14  ;;  %v2786_v48 = vpack.c.bf16 %v432_v29, %v431_v25  ;;  %vm3448_vm14 = vmand %vm33_vm6, %vm37_vm4  ;;  %v865_v29 = vld [vmem:[%s3864_s1 + $0x40] sm:$0xff] }
 0x24b   :  { %2656 = vmatmul.mubr.msk.f32.gmra.mrb[10].mxu0 %vm245_vm1, %v499_v37  ;;  %2662 = vmatmul.mubr.msk.f32.gmra.mrb[10].mxu1 %vm245_vm1, %v499_v37  ;;  %vm3439_vm0 = vmand %vm36_vm7, %vm40_vm2  ;;  %vm1051_vm7 = vcmp.lt.s32.totalorder %v3256_v17, 2  ;;  %vm3890_vm10 = vcmp.ge.s32.totalorder %v3285_v40, 2 }
 0x24c   :  { %v841_v49 = vsel %vm836_vm12, %v2985_v42, %v3025_v47  ;;  %v842_v50 = vsel %vm836_vm12, %v2986_v41, %v3026_v46  ;;  %2782 = vmatpush1.bf16.msk.msra.mxu0 %vm2781_vm13, %v2780_v45  ;;  %2785 = vmatprep.subr.msk.bf16.mxu1 %vm2784_vm5, %v2783_v39  ;;  %v2989_v52 = vpop.permute.xlu0 %2988  ;;  %vm3461_vm5 = vmand %vm35_vm9, %vm39_vm15  ;;  %v866_v45 = vld [vmem:[%s3864_s1 + $0x48] sm:$0xff] }
 0x24d   :  { %v2789_v53 = vpack.c.bf16 %v842_v50, %v841_v49  ;;  %v2991_v54 = vunpack.i.h.bf16 %v2989_v52  ;;  %v2990_v55 = vunpack.i.l.bf16 %v2989_v52  ;;  %2788 = vmatpush1.bf16.msk.msra.mxu1 %vm2787_vm8, %v2786_v48  ;;  %v3029_v56 = vpop.permute.xlu1 %3028  ;;  %730 = vmatprep.mubr.f32.mxu0 %v3150_v5  ;;  %vm2796_vm6 = vmpackc.low %vm3439_vm0, %vm3439_vm0 }
 0x24e   :  { %v3031_v58 = vunpack.i.h.bf16 %v3029_v56  ;;  %v3030_v59 = vunpack.i.l.bf16 %v3029_v56  ;;  %807 = vmatprep.mubr.f32.mxu1 %v3150_v5  ;;  %vm2793_vm9 = vmpackc.low %vm3448_vm14, %vm3448_vm14  ;;  %vm3892_vm14 = vcmp.ge.s32.totalorder %v3310_v51, 2 }
 0x24f   :  { %v839_v61 = vsel %vm836_vm12, %v3025_v47, %v2990_v55  ;;  %2667 = vmatmul.mubr.msk.f32.vlgmr.msra.gmra.mrb[8].mxu0 %vm245_vm1, %v3229_v11  ;;  %2791 = vmatprep.subr.msk.bf16.mxu0 %vm2790_vm3, %v2789_v53  ;;  %v840_v63 = vsel %vm836_vm12, %v3026_v46, %v2991_v54  ;;  %vm2799_vm11 = vmpackc.low %vm3461_vm5, %vm3461_vm5  ;;  %vm3891_vm3 = vcmp.ge.s32.totalorder %v3275_v36, 2  ;;  %v1076_v53 = vld [vmem:[%s3864_s1 + $0x50] sm:$0xff] }
 0x250   :  { %v837_v0 = vsel %vm836_vm12, %v2990_v55, %v3030_v59  ;;  %v838_v1 = vsel %vm836_vm12, %v2991_v54, %v3031_v58  ;;  %v843_v2 = vsel %vm836_vm12, %v3030_v59, %v2985_v42  ;;  %2673 = vmatmul.mubr.msk.f32.vlgmr.msra.gmra.mrb[8].mxu1 %vm245_vm1, %v3229_v11  ;;  %v2994_v3 = vpop.permute.xlu0 %2993  ;;  %v844_v4 = vsel %vm836_vm12, %v3031_v58, %v2986_v41  ;;  %vm2808_vm8 = vmpackc.low %vm3890_vm10, %vm3890_vm10 }
 0x251   :  { %v2795_v6 = vpack.c.bf16 %v838_v1, %v837_v0  ;;  %v2996_v16 = vunpack.i.h.bf16 %v2994_v3  ;;  %v2995_v18 = vunpack.i.l.bf16 %v2994_v3  ;;  %v3034_v19 = vpop.permute.xlu1 %3033  ;;  %736 = vmatprep.mubr.f32.mxu0 %v3150_v5  ;;  %813 = vmatprep.mubr.f32.mxu1 %v3150_v5  ;;  %v2792_v11 = vpack.c.bf16 %v844_v4, %v843_v2  ;;  %vm2805_vm0 = vmpackc.low %vm3891_vm3, %vm3891_vm3 }
 0x252   :  { %v3036_v20 = vunpack.i.h.bf16 %v3034_v19  ;;  %v3035_v21 = vunpack.i.l.bf16 %v3034_v19  ;;  %v2798_v22 = vpack.c.bf16 %v840_v63, %v839_v61  ;;  %vm3889_vm12 = vcmp.ge.s32.totalorder %v3264_v26, 2  ;;  %vm2811_vm5 = vmpackc.low %vm3892_vm14, %vm3892_vm14 }
 0x253   :  { %2668 = vmatmul.mubr.msk.f32.gmra.mrb[10].mxu0 %vm245_vm1, %v3234_v12  ;;  %2797 = vmatprep.subr.msk.bf16.mxu1 %vm2796_vm6, %v2795_v6  ;;  %vm2802_vm13 = vmpackc.low %vm3889_vm12, %vm3889_vm12  ;;  %vm3893_vm6 = vcmp.lt.s32.totalorder %v3264_v26, 14  ;;  %vm30_vm12 = vcmp.lt.s32.totalorder %v3262_v23, 14  ;;  %vm1643_vm10 = vcmp.lt.s32.totalorder %v3256_v17, 98  ;;  %vm3896_vm3 = vcmp.ge.s32.totalorder %v3264_v26, 2 }
 0x254   :  { %v1056_v24 = vsel %vm1051_vm7, %v2995_v18, %v3035_v21  ;;  %v1057_v25 = vsel %vm1051_vm7, %v2996_v16, %v3036_v20  ;;  %2674 = vmatmul.mubr.msk.f32.gmra.mrb[10].mxu1 %vm245_vm1, %v3234_v12  ;;  %2794 = vmatpush1.bf16.msk.msra.mxu0 %vm2793_vm9, %v2792_v11  ;;  %v2999_v27 = vpop.permute.xlu0 %2998  ;;  %vm2822_vm9 = vmpackc.low %vm3893_vm6, %vm3893_vm6  ;;  %v1246_v11 = vld [vmem:[%s3864_s1 + $0x60] sm:$0xff]  ;;  %vm3899_vm14 = vcmp.ge.s32.totalorder %v3285_v40, 2  ;;  %vm29_vm6 = vcmp.lt.s32.totalorder %v3267_v28, 14  ;;  %v1883_v28 = vld [vmem:[%s3864_s1 + $0x90] sm:$0xff] }
 0x255   :  { %v2801_v30 = vpack.c.bf16 %v1057_v25, %v1056_v24  ;;  %v3001_v31 = vunpack.i.h.bf16 %v2999_v27  ;;  %v3000_v33 = vunpack.i.l.bf16 %v2999_v27  ;;  %2800 = vmatpush1.bf16.msk.msra.mxu1 %vm2799_vm11, %v2798_v22  ;;  %v3039_v34 = vpop.permute.xlu1 %3038  ;;  %937 = vmatprep.mubr.f32.mxu0 %v3150_v5  ;;  %vm2828_vm11 = vmpackc.low %vm40_vm2, %vm40_vm2 }
 0x256   :  { %v3041_v37 = vunpack.i.h.bf16 %v3039_v34  ;;  %v3040_v38 = vunpack.i.l.bf16 %v3039_v34  ;;  %1014 = vmatprep.mubr.f32.mxu1 %v3150_v5 }
 0x257   :  { %v1054_v12 = vsel %vm1051_vm7, %v3035_v21, %v3000_v33  ;;  %2679 = vmatmul.mubr.msk.f32.vlgmr.msra.gmra.mrb[8].mxu0 %vm245_vm1, %v865_v29  ;;  %2803 = vmatprep.subr.msk.bf16.mxu0 %vm2802_vm13, %v2801_v30  ;;  %v1055_v39 = vsel %vm1051_vm7, %v3036_v20, %v3001_v31  ;;  %vm32_vm13 = vcmp.lt.s32.totalorder %v3270_v32, 14 }
 0x258   :  { %v1052_v41 = vsel %vm1051_vm7, %v3000_v33, %v3040_v38  ;;  %v1053_v42 = vsel %vm1051_vm7, %v3001_v31, %v3041_v37  ;;  %v1058_v43 = vsel %vm1051_vm7, %v3040_v38, %v2995_v18  ;;  %2685 = vmatmul.mubr.msk.f32.vlgmr.msra.gmra.mrb[8].mxu1 %vm245_vm1, %v865_v29  ;;  %v3044_v44 = vpop.permute.xlu0 %3043  ;;  %v1059_v46 = vsel %vm1051_vm7, %v3041_v37, %v2996_v16  ;;  %v1672_v29 = vld [vmem:[%s3864_s1 + $0x80] sm:$0xff] }
 0x259   :  { %v2807_v47 = vpack.c.bf16 %v1053_v42, %v1052_v41  ;;  %v3084_v48 = vpop.permute.xlu1 %3083  ;;  %943 = vmatprep.mubr.f32.mxu0 %v3150_v5  ;;  %1020 = vmatprep.mubr.f32.mxu1 %v3150_v5  ;;  %v2804_v49 = vpack.c.bf16 %v1059_v46, %v1058_v43  ;;  %v2810_v50 = vpack.c.bf16 %v1055_v39, %v1054_v12  ;;  %v3045_v59 = vunpack.i.l.bf16 %v3044_v44  ;;  %v1247_v46 = vld [vmem:[%s3864_s1 + $0x68] sm:$0xff] }
 0x25a   :  { %v3086_v54 = vunpack.i.h.bf16 %v3084_v48  ;;  %v3085_v55 = vunpack.i.l.bf16 %v3084_v48  ;;  %vm1432_vm7 = vcmp.lt.s32.totalorder %v3256_v17, 126  ;;  %v3046_v62 = vunpack.i.h.bf16 %v3044_v44 }
 0x25b   :  { %2680 = vmatmul.mubr.msk.f32.gmra.mrb[10].mxu0 %vm245_vm1, %v866_v45  ;;  %2809 = vmatprep.subr.msk.bf16.mxu1 %vm2808_vm8, %v2807_v47  ;;  %vm3586_vm8 = vmpackc.low %vm37_vm4, %vm37_vm4 }
 0x25c   :  { %2686 = vmatmul.mubr.msk.f32.gmra.mrb[10].mxu1 %vm245_vm1, %v866_v45  ;;  %2806 = vmatpush1.bf16.msk.msra.mxu0 %vm2805_vm0, %v2804_v49  ;;  %v3049_v52 = vpop.permute.xlu0 %3048  ;;  %v1437_v16 = vsel %vm1432_vm7, %v3045_v59, %v3085_v55  ;;  %vm3596_vm0 = vmand %vm30_vm12, %vm3896_vm3  ;;  %vm3904_vm3 = vcmp.ge.s32.totalorder %v3275_v36, 2 }
 0x25d   :  { %v3051_v56 = vunpack.i.h.bf16 %v3049_v52  ;;  %v3050_v57 = vunpack.i.l.bf16 %v3049_v52  ;;  %2812 = vmatpush1.bf16.msk.msra.mxu1 %vm2811_vm5, %v2810_v50  ;;  %2814 = vmatprep.subr.bf16.mxu0 %v3218_v7  ;;  %v3089_v58 = vpop.permute.xlu1 %3088  ;;  %vm3605_vm5 = vmand %vm32_vm13, %vm3899_vm14  ;;  %vm1858_vm14 = vcmp.lt.s32.totalorder %v3256_v17, 96 }
 0x25e   :  { %v3091_v60 = vunpack.i.h.bf16 %v3089_v58  ;;  %v3090_v61 = vunpack.i.l.bf16 %v3089_v58  ;;  %1148 = vmatprep.mubr.f32.mxu0 %v3150_v5  ;;  %2818 = vmatprep.subr.bf16.mxu1 %v3220_v8  ;;  %v1077_v8 = vld [vmem:[%s3864_s1 + $0x58] sm:$0xff] }
 0x25f   :  { %v1435_v63 = vsel %vm1432_vm7, %v3085_v55, %v3050_v57  ;;  %v1436_v0 = vsel %vm1432_vm7, %v3086_v54, %v3051_v56  ;;  %2691 = vmatmul.mubr.msk.f32.vlgmr.msra.gmra.mrb[8].mxu0 %vm245_vm1, %v1076_v53  ;;  %1225 = vmatprep.mubr.f32.mxu1 %v3150_v5 }
 0x260   :  { %v2821_v7 = vpack.c.bf16 %v1436_v0, %v1435_v63  ;;  %v1439_v1 = vsel %vm1432_vm7, %v3090_v61, %v3045_v59  ;;  %2697 = vmatmul.mubr.msk.f32.vlgmr.msra.gmra.mrb[8].mxu1 %vm245_vm1, %v1076_v53  ;;  %v3550_v2 = vpop.permute.xlu0 %3053  ;;  %v1440_v3 = vsel %vm1432_vm7, %v3091_v60, %v3046_v62  ;;  %2816 = vmatpush1.bf16.msra.mxu0 %v3222_v9 }
 0x261   :  { %2820 = vmatpush1.bf16.msra.mxu1 %v3224_v10  ;;  %v3094_v4 = vpop.permute.xlu1 %3093  ;;  %v2827_v6 = vpack.c.bf16 %v1440_v3, %v1439_v1  ;;  %1154 = vmatprep.mubr.f32.mxu0 %v3150_v5  ;;  %v1438_v9 = vsel %vm1432_vm7, %v3046_v62, %v3086_v54  ;;  %v1433_v10 = vsel %vm1432_vm7, %v3050_v57, %v3090_v61  ;;  %v3055_v31 = vunpack.i.l.bf16 %v3550_v2  ;;  %v1457_v57 = vld [vmem:[%s3864_s1 + $0x70] sm:$0xff] }
 0x262   :  { %1231 = vmatprep.mubr.f32.mxu1 %v3150_v5  ;;  %2823 = vmatprep.subr.msk.bf16.mxu0 %vm2822_vm9, %v2821_v7  ;;  %v1434_v18 = vsel %vm1432_vm7, %v3051_v56, %v3091_v60  ;;  %v3096_v21 = vunpack.i.h.bf16 %v3094_v4  ;;  %v3095_v22 = vunpack.i.l.bf16 %v3094_v4  ;;  %v2824_v30 = vpack.c.bf16 %v1438_v9, %v1437_v16  ;;  %vm3618_vm7 = vmpackc.low %vm39_vm15, %vm39_vm15 }
 0x263   :  { %2692 = vmatmul.mubr.msk.f32.gmra.mrb[10].mxu0 %vm245_vm1, %v1077_v8  ;;  %2829 = vmatprep.subr.msk.bf16.mxu1 %vm2828_vm11, %v2827_v6  ;;  %v3056_v38 = vunpack.i.h.bf16 %v3550_v2  ;;  %v2830_v42 = vpack.c.bf16 %v1434_v18, %v1433_v10  ;;  %vm2834_vm9 = vmpackc.low %vm3596_vm0, %vm3596_vm0  ;;  %v1458_v18 = vld [vmem:[%s3864_s1 + $0x78] sm:$0xff] }
 0x264   :  { %2698 = vmatmul.mubr.msk.f32.gmra.mrb[10].mxu1 %vm245_vm1, %v1077_v8  ;;  %v3059_v19 = vpop.permute.xlu0 %3058  ;;  %1318 = vmatprep.mubr.f32.mxu0 %v3150_v5  ;;  %vm2840_vm11 = vmpackc.low %vm3605_vm5, %vm3605_vm5  ;;  %v1648_v52 = vsel %vm1643_vm10, %v3055_v31, %v3095_v22  ;;  %vm3907_vm5 = vcmp.ge.s32.totalorder %v3310_v51, 2  ;;  %v2098_v51 = vld [vmem:[%s3864_s1 + $0xa0] sm:$0xff] }
 0x265   :  { %v3061_v24 = vunpack.i.h.bf16 %v3059_v19  ;;  %v3060_v25 = vunpack.i.l.bf16 %v3059_v19  ;;  %v3099_v27 = vpop.permute.xlu1 %3098  ;;  %1395 = vmatprep.mubr.f32.mxu1 %v3150_v5  ;;  %vm3648_vm0 = vmand %vm29_vm6, %vm3904_vm3  ;;  %v1649_v53 = vsel %vm1643_vm10, %v3056_v38, %v3096_v21 }
 0x266   :  { %v3101_v33 = vunpack.i.h.bf16 %v3099_v27  ;;  %v3100_v34 = vunpack.i.l.bf16 %v3099_v27  ;;  %v2836_v0 = vpack.c.bf16 %v1649_v53, %v1648_v52  ;;  %vm2852_vm3 = vmpackc.low %vm32_vm13, %vm32_vm13 }
 0x267   :  { %v1646_v12 = vsel %vm1643_vm10, %v3095_v22, %v3060_v25  ;;  %v1647_v39 = vsel %vm1643_vm10, %v3096_v21, %v3061_v24  ;;  %2699 = vmatmul.mubr.msk.f32.vlgmr.msra.gmra.mrb[8].mxu0 %vm245_vm1, %v1246_v11 }
 0x268   :  { %v2833_v43 = vpack.c.bf16 %v1647_v39, %v1646_v12  ;;  %v1650_v44 = vsel %vm1643_vm10, %v3100_v34, %v3055_v31  ;;  %2826 = vmatpush1.bf16.msk.msra.mxu0 %vm3586_vm8, %v2824_v30  ;;  %v3064_v45 = vpop.permute.xlu0 %3063  ;;  %v1651_v47 = vsel %vm1643_vm10, %v3101_v33, %v3056_v38  ;;  %2701 = vmatmul.mubr.msk.f32.vlgmr.msra.gmra.mrb[8].mxu1 %vm245_vm1, %v1246_v11  ;;  %vm31_vm8 = vcmp.lt.s32.totalorder %v3272_v35, 14 }
 0x269   :  { %v3104_v48 = vpop.permute.xlu1 %3103  ;;  %1324 = vmatprep.mubr.f32.mxu0 %v3150_v5  ;;  %v2839_v49 = vpack.c.bf16 %v1651_v47, %v1650_v44  ;;  %2832 = vmatpush1.bf16.msk.msra.mxu1 %vm3618_vm7, %v2830_v42  ;;  %v1644_v54 = vsel %vm1643_vm10, %v3060_v25, %v3100_v34  ;;  %v1645_v55 = vsel %vm1643_vm10, %v3061_v24, %v3101_v33  ;;  %vm3670_vm7 = vmand %vm31_vm8, %vm3907_vm5  ;;  %v3065_v7 = vunpack.i.l.bf16 %v3064_v45  ;;  %v1673_v47 = vld [vmem:[%s3864_s1 + $0x88] sm:$0xff] }
 0x26a   :  { %1401 = vmatprep.mubr.f32.mxu1 %v3150_v5  ;;  %2835 = vmatprep.subr.msk.bf16.mxu0 %vm2834_vm9, %v2833_v43  ;;  %v3106_v59 = vunpack.i.h.bf16 %v3104_v48  ;;  %v3105_v60 = vunpack.i.l.bf16 %v3104_v48  ;;  %vm2837_vm10 = vmpackc.low %vm3648_vm0, %vm3648_vm0  ;;  %v3066_v8 = vunpack.i.h.bf16 %v3064_v45  ;;  %v2842_v6 = vpack.c.bf16 %v1645_v55, %v1644_v54 }
 0x26b   :  { %2700 = vmatmul.mubr.msk.f32.gmra.mrb[10].mxu0 %vm245_vm1, %v1247_v46  ;;  %2841 = vmatprep.subr.msk.bf16.mxu1 %vm2840_vm11, %v2839_v49  ;;  %vm2843_vm9 = vmpackc.low %vm3670_vm7, %vm3670_vm7  ;;  %vm2069_vm0 = vcmp.lt.s32.totalorder %v3256_v17, 94  ;;  %v1884_v17 = vld [vmem:[%s3864_s1 + $0x98] sm:$0xff] }
 0x26c   :  { %v3069_v56 = vpop.permute.xlu0 %3068  ;;  %1529 = vmatprep.mubr.f32.mxu0 %v3150_v5  ;;  %2702 = vmatmul.mubr.msk.f32.gmra.mrb[10].mxu1 %vm245_vm1, %v1247_v46  ;;  %vm2846_vm11 = vmpackc.low %vm30_vm12, %vm30_vm12  ;;  %v1863_v21 = vsel %vm1858_vm14, %v3065_v7, %v3105_v60  ;;  %v1864_v22 = vsel %vm1858_vm14, %v3066_v8, %v3106_v59 }
 0x26d   :  { %v3071_v61 = vunpack.i.h.bf16 %v3069_v56  ;;  %v3070_v62 = vunpack.i.l.bf16 %v3069_v56  ;;  %v3109_v63 = vpop.permute.xlu1 %3108  ;;  %1606 = vmatprep.mubr.f32.mxu1 %v3150_v5  ;;  %vm3720_vm5 = vmpackc.low %vm29_vm6, %vm29_vm6  ;;  %v2848_v39 = vpack.c.bf16 %v1864_v22, %v1863_v21  ;;  %v2099_v56 = vld [vmem:[%s3864_s1 + $0xa8] sm:$0xff] }
 0x26e   :  { %v3111_v1 = vunpack.i.h.bf16 %v3109_v63  ;;  %v3110_v2 = vunpack.i.l.bf16 %v3109_v63 }
 0x26f   :  { %v1861_v3 = vsel %vm1858_vm14, %v3105_v60, %v3070_v62  ;;  %v1862_v4 = vsel %vm1858_vm14, %v3106_v59, %v3071_v61  ;;  %2707 = vmatmul.mubr.msk.f32.vlgmr.msra.gmra.mrb[8].mxu0 %vm245_vm1, %v1457_v57 }
 0x270   :  { %v2845_v16 = vpack.c.bf16 %v1862_v4, %v1861_v3  ;;  %v1865_v9 = vsel %vm1858_vm14, %v3110_v2, %v3065_v7  ;;  %2838 = vmatpush1.bf16.msk.msra.mxu0 %vm2837_vm10, %v2836_v0  ;;  %v3074_v10 = vpop.permute.xlu0 %3073  ;;  %v1866_v19 = vsel %vm1858_vm14, %v3111_v1, %v3066_v8  ;;  %2713 = vmatmul.mubr.msk.f32.vlgmr.msra.gmra.mrb[8].mxu1 %vm245_vm1, %v1457_v57  ;;  %vm3738_vm10 = vmand %vm32_vm13, %vm40_vm2 }
 0x271   :  { %v3114_v11 = vpop.permute.xlu1 %3113  ;;  %1535 = vmatprep.mubr.f32.mxu0 %v3150_v5  ;;  %v2851_v20 = vpack.c.bf16 %v1866_v19, %v1865_v9  ;;  %2844 = vmatpush1.bf16.msk.msra.mxu1 %vm2843_vm9, %v2842_v6  ;;  %v1859_v24 = vsel %vm1858_vm14, %v3070_v62, %v3110_v2  ;;  %v1860_v25 = vsel %vm1858_vm14, %v3071_v61, %v3111_v1  ;;  %vm3912_vm14 = vcmp.lt.s32.totalorder %v3264_v26, 14  ;;  %vm2864_vm13 = vmpackc.low %vm3738_vm10, %vm3738_vm10 }
 0x272   :  { %1612 = vmatprep.mubr.f32.mxu1 %v3150_v5  ;;  %2847 = vmatprep.subr.msk.bf16.mxu0 %vm2846_vm11, %v2845_v16  ;;  %v3116_v31 = vunpack.i.h.bf16 %v3114_v11  ;;  %v3115_v33 = vunpack.i.l.bf16 %v3114_v11  ;;  %vm3729_vm7 = vmand %vm30_vm12, %vm3912_vm14  ;;  %v3075_v41 = vunpack.i.l.bf16 %v3074_v10  ;;  %v3076_v26 = vunpack.i.h.bf16 %v3074_v10 }
 0x273   :  { %2708 = vmatmul.mubr.msk.f32.gmra.mrb[10].mxu0 %vm245_vm1, %v1458_v18  ;;  %2853 = vmatprep.subr.msk.bf16.mxu1 %vm2852_vm3, %v2851_v20  ;;  %vm2855_vm12 = vmpackc.low %vm31_vm8, %vm31_vm8  ;;  %v2854_v40 = vpack.c.bf16 %v1860_v25, %v1859_v24 }
 0x274   :  { %v3079_v27 = vpop.permute.xlu0 %3078  ;;  %1744 = vmatprep.mubr.f32.mxu0 %v3150_v5  ;;  %2714 = vmatmul.mubr.msk.f32.gmra.mrb[10].mxu1 %vm245_vm1, %v1458_v18  ;;  %vm2858_vm2 = vmpackc.low %vm3729_vm7, %vm3729_vm7  ;;  %v2074_v52 = vsel %vm2069_vm0, %v3075_v41, %v3115_v33  ;;  %v2075_v53 = vsel %vm2069_vm0, %v3076_v26, %v3116_v31 }
 0x275   :  { %v3081_v34 = vunpack.i.h.bf16 %v3079_v27  ;;  %v3080_v37 = vunpack.i.l.bf16 %v3079_v27  ;;  %v3119_v38 = vpop.permute.xlu1 %3118  ;;  %1821 = vmatprep.mubr.f32.mxu1 %v3150_v5  ;;  %vm3772_vm9 = vmand %vm29_vm6, %vm37_vm4  ;;  %v2860_v55 = vpack.c.bf16 %v2075_v53, %v2074_v52 }
 0x276   :  { %v3121_v42 = vunpack.i.h.bf16 %v3119_v38  ;;  %v3120_v43 = vunpack.i.l.bf16 %v3119_v38  ;;  %vm2080_vm4 = vmand %vm31_vm8, %vm39_vm15 }
 0x277   :  { %v2072_v23 = vsel %vm2069_vm0, %v3115_v33, %v3080_v37  ;;  %v2073_v45 = vsel %vm2069_vm0, %v3116_v31, %v3081_v34  ;;  %2719 = vmatmul.mubr.msk.f32.vlgmr.msra.gmra.mrb[8].mxu0 %vm245_vm1, %v1672_v29  ;;  %vm2861_vm6 = vmpackc.low %vm3772_vm9, %vm3772_vm9 }
 0x278   :  { %v2857_v46 = vpack.c.bf16 %v2073_v45, %v2072_v23  ;;  %v2076_v32 = vsel %vm2069_vm0, %v3120_v43, %v3075_v41  ;;  %2850 = vmatpush1.bf16.msk.msra.mxu0 %vm3720_vm5, %v2848_v39  ;;  %v2077_v48 = vsel %vm2069_vm0, %v3121_v42, %v3076_v26  ;;  %2725 = vmatmul.mubr.msk.f32.vlgmr.msra.gmra.mrb[8].mxu1 %vm245_vm1, %v1672_v29  ;;  %vm2867_vm11 = vmpackc.low %vm2080_vm4, %vm2080_vm4 }
 0x279   :  { %1750 = vmatprep.mubr.f32.mxu0 %v3150_v5  ;;  %v2863_v49 = vpack.c.bf16 %v2077_v48, %v2076_v32  ;;  %2856 = vmatpush1.bf16.msk.msra.mxu1 %vm2855_vm12, %v2854_v40  ;;  %v2070_v36 = vsel %vm2069_vm0, %v3080_v37, %v3120_v43  ;;  %v2071_v54 = vsel %vm2069_vm0, %v3081_v34, %v3121_v42 }
 0x27a   :  { %1827 = vmatprep.mubr.f32.mxu1 %v3150_v5  ;;  %2859 = vmatprep.subr.msk.bf16.mxu0 %vm2858_vm2, %v2857_v46  ;;  %v2866_v35 = vpack.c.bf16 %v2071_v54, %v2070_v36 }
 0x27b   :  { %2720 = vmatmul.mubr.msk.f32.gmra.mrb[10].mxu0 %vm245_vm1, %v1673_v47  ;;  %2865 = vmatprep.subr.msk.bf16.mxu1 %vm2864_vm13, %v2863_v49 }
 0x27c   :  { %1955 = vmatprep.mubr.f32.mxu0 %v3150_v5  ;;  %2726 = vmatmul.mubr.msk.f32.gmra.mrb[10].mxu1 %vm245_vm1, %v1673_v47 }
 0x27d   :  { %2032 = vmatprep.mubr.f32.mxu1 %v3150_v5 }
 0x27f   :  { %2731 = vmatmul.mubr.msk.f32.vlgmr.msra.gmra.mrb[8].mxu0 %vm245_vm1, %v1883_v28 }
 0x280   :  { %2862 = vmatpush1.bf16.msk.msra.mxu0 %vm2861_vm6, %v2860_v55  ;;  %1961 = vmatprep.mubr.f32.mxu0 %v3150_v5 }
 0x281   :  { %2737 = vmatmul.mubr.msk.f32.vlgmr.msra.gmra.mrb[8].mxu1 %vm245_vm1, %v1883_v28 }
 0x282   :  { %2868 = vmatpush1.bf16.msk.msra.mxu1 %vm2867_vm11, %v2866_v35  ;;  %2038 = vmatprep.mubr.f32.mxu1 %v3150_v5 }
 0x283   :  { %2732 = vmatmul.mubr.msk.f32.gmra.mrb[10].mxu0 %vm245_vm1, %v1884_v17 }
 0x284   :  { %2170 = vmatprep.mubr.f32.mxu0 %v3150_v5 }
 0x285   :  { %2738 = vmatmul.mubr.msk.f32.gmra.mrb[10].mxu1 %vm245_vm1, %v1884_v17  ;;  %v2270_v59 = vpop.permute.xlu0 %2269 }
 0x286   :  { %2247 = vmatprep.mubr.f32.mxu1 %v3150_v5  ;;  %v2274_v63 = vpop.permute.xlu1 %2273 }
 0x287   :  { %2743 = vmatmul.mubr.msk.f32.vlgmr.msra.gmra.mrb[8].mxu0 %vm245_vm1, %v2098_v51 }
 0x288   :  { %2176 = vmatprep.mubr.f32.mxu0 %v3150_v5 }
 0x289   :  { %2749 = vmatmul.mubr.msk.f32.vlgmr.msra.gmra.mrb[8].mxu1 %vm245_vm1, %v2098_v51  ;;  %v2295_v37 = vpop.permute.xlu0 %2294 }
 0x28a   :  { %2253 = vmatprep.mubr.f32.mxu1 %v3150_v5  ;;  %v2300_v41 = vpop.permute.xlu1 %2299 }
 0x28b   :  { %2744 = vmatmul.mubr.msk.f32.gmra.mrb[10].mxu0 %vm245_vm1, %v2099_v56 }
 0x28c   :  { %2370 = vmatprep.mubr.f32.mxu0 %v3150_v5 }
 0x28d   :  { %2750 = vmatmul.mubr.msk.f32.gmra.mrb[10].mxu1 %vm245_vm1, %v2099_v56  ;;  %v2471_v17 = vpop.permute.xlu0 %2470 }
 0x28e   :  { %2447 = vmatprep.mubr.f32.mxu1 %v3150_v5 }
 0x35a   :  { %v2172_v57 = vpop.f32.mrb[8].mxu0 }
 0x35b   :  { %v2174_v58 = vpop.f32.mrb[9].mxu0  ;;  %v2276_v61 = vadd.f32 %v2270_v59, %v2172_v57 }
 0x35c   :  { %v2249_v60 = vpop.f32.mrb[8].mxu1  ;;  %v2277_v0 = vadd.f32 %v2270_v59, %v2174_v58 }
 0x35d   :  { %v2251_v62 = vpop.f32.mrb[9].mxu1  ;;  %v2278_v1 = vadd.f32 %v2270_v59, %v2249_v60  ;;  %v2284_v16 = vmax.f32 %v2276_v61, 0.0  ;;  %v3122_v60 = vld [vmem:[%s3863_s0] sm:$0xff] }
 0x35e   :  { %v2178_v7 = vpop.f32.mrb[10].mxu0  ;;  %v2279_v3 = vadd.f32 %v2270_v59, %v2251_v62  ;;  %v2285_v19 = vmax.f32 %v2277_v0, 0.0  ;;  %v3123_v0 = vld [vmem:[%s3863_s0 + $0x8] sm:$0xff] }
 0x35f   :  { %v2280_v2 = vadd.f32 %v2274_v63, %v2178_v7  ;;  %v2180_v8 = vpop.f32.mrb[11].mxu0  ;;  %v2286_v21 = vmax.f32 %v2278_v1, 0.0 }
 0x360   :  { %v2281_v4 = vadd.f32 %v2274_v63, %v2180_v8  ;;  %v2255_v6 = vpop.f32.mrb[10].mxu1  ;;  %v2287_v25 = vmax.f32 %v2279_v3, 0.0 }
 0x361   :  { %v2288_v9 = vmax.f32 %v2280_v2, 0.0  ;;  %v2282_v10 = vadd.f32 %v2274_v63, %v2255_v6  ;;  %v2257_v18 = vpop.f32.mrb[11].mxu1  ;;  %v3124_v2 = vld [vmem:[%s3863_s0 + $0x10] sm:$0xff] }
 0x362   :  { %v2289_v11 = vmax.f32 %v2281_v4, 0.0  ;;  %v2283_v20 = vadd.f32 %v2274_v63, %v2257_v18  ;;  %v3125_v4 = vld [vmem:[%s3863_s0 + $0x18] sm:$0xff] }
 0x363   :  { %v2871_v22 = vpack.c.bf16 %v2288_v9, %v2284_v16  ;;  %v2290_v24 = vmax.f32 %v2282_v10, 0.0 }
 0x364   :  { %v2869_v27 = vpack.c.bf16 %v2289_v11, %v2285_v19  ;;  %v2291_v29 = vmax.f32 %v2283_v20, 0.0 }
 0x365   :  { %v2875_v30 = vpack.c.bf16 %v2290_v24, %v2286_v21 }
 0x366   :  { %v2873_v31 = vpack.c.bf16 %v2291_v29, %v2287_v25  ;;  %2870 = vmatprep.subr.bf16.mxu0 %v2869_v27 }
 0x367   :  { %2872 = vmatpush1.bf16.msra.mxu0 %v2871_v22 }
 0x368   :  { %2874 = vmatprep.subr.bf16.mxu1 %v2873_v31 }
 0x369   :  { %2876 = vmatpush1.bf16.msra.mxu1 %v2875_v30 }
 0x36a   :  { %2751 = vmatmul.mubr.msk.f32.vlgmr.msra.gmra.mrb[12].mxu0 %vm245_vm1, %v3241_v13 }
 0x36b   :  { %2376 = vmatprep.mubr.f32.mxu0 %v3150_v5 }
 0x36c   :  { %2753 = vmatmul.mubr.msk.f32.vlgmr.msra.gmra.mrb[12].mxu1 %vm245_vm1, %v3241_v13 }
 0x36d   :  { %2453 = vmatprep.mubr.f32.mxu1 %v3150_v5 }
 0x36e   :  { %2752 = vmatmul.mubr.msk.f32.gmra.mrb[14].mxu0 %vm245_vm1, %v3246_v14 }
 0x36f   :  { %2539 = vmatprep.mubr.f32.mxu0 %v3150_v5 }
 0x370   :  { %2754 = vmatmul.mubr.msk.f32.gmra.mrb[14].mxu1 %vm245_vm1, %v3246_v14 }
 0x371   :  { %2610 = vmatprep.mubr.f32.mxu1 %v3150_v5 }
 0x43d   :  { %v2372_v33 = vpop.f32.mrb[12].mxu0 }
 0x43e   :  { %v2374_v34 = vpop.f32.mrb[13].mxu0  ;;  %v2373_v12 = vadd.f32 %v2372_v33, %v2295_v37 }
 0x43f   :  { %v2449_v38 = vpop.f32.mrb[12].mxu1  ;;  %v2375_v13 = vadd.f32 %v2374_v34, %v2295_v37 }
 0x440   :  { %v2451_v39 = vpop.f32.mrb[13].mxu1  ;;  %v2450_v43 = vadd.f32 %v2449_v38, %v2295_v37  ;;  %v2460_v46 = vmax.f32 %v2373_v12, 0.0 }
 0x441   :  { %v2378_v42 = vpop.f32.mrb[14].mxu0  ;;  %v2452_v23 = vadd.f32 %v2451_v39, %v2295_v37  ;;  %v2461_v5 = vmax.f32 %v2375_v13, 0.0 }
 0x442   :  { %v2379_v44 = vadd.f32 %v2378_v42, %v2300_v41  ;;  %v2380_v26 = vpop.f32.mrb[15].mxu0  ;;  %v2462_v50 = vmax.f32 %v2450_v43, 0.0 }
 0x443   :  { %v2381_v45 = vadd.f32 %v2380_v26, %v2300_v41  ;;  %v2455_v40 = vpop.f32.mrb[14].mxu1  ;;  %v2463_v28 = vmax.f32 %v2452_v23, 0.0 }
 0x444   :  { %v2464_v32 = vmax.f32 %v2379_v44, 0.0  ;;  %v2456_v14 = vadd.f32 %v2455_v40, %v2300_v41  ;;  %v2457_v47 = vpop.f32.mrb[15].mxu1 }
 0x445   :  { %v2465_v48 = vmax.f32 %v2381_v45, 0.0  ;;  %v2458_v49 = vadd.f32 %v2457_v47, %v2300_v41 }
 0x446   :  { %v2879_v52 = vpack.c.bf16 %v2464_v32, %v2460_v46  ;;  %v2466_v53 = vmax.f32 %v2456_v14, 0.0 }
 0x447   :  { %v2877_v36 = vpack.c.bf16 %v2465_v48, %v2461_v5  ;;  %v2467_v54 = vmax.f32 %v2458_v49, 0.0 }
 0x448   :  { %v2883_v55 = vpack.c.bf16 %v2466_v53, %v2462_v50 }
 0x449   :  { %v2881_v35 = vpack.c.bf16 %v2467_v54, %v2463_v28  ;;  %2878 = vmatprep.subr.bf16.mxu0 %v2877_v36 }
 0x44a   :  { %2880 = vmatpush1.bf16.msra.mxu0 %v2879_v52 }
 0x44b   :  { %2882 = vmatprep.subr.bf16.mxu1 %v2881_v35 }
 0x44c   :  { %2884 = vmatpush1.bf16.msra.mxu1 %v2883_v55 }
 0x44d   :  { %2755 = vmatmul.mubr.msk.f32.vlgmr.msra.gmra.mrb[16].mxu0 %vm245_vm1, %v3253_v15 }
 0x44f   :  { %2756 = vmatmul.mubr.msk.f32.vlgmr.msra.gmra.mrb[16].mxu1 %vm245_vm1, %v3253_v15 }
 0x520   :  { %v2541_v51 = vpop.f32.mrb[16].mxu0 }
 0x521   :  { %v2542_v56 = vadd.f32 %v2541_v51, %v2471_v17  ;;  %v2543_v57 = vpop.f32.mrb[17].mxu0 }
 0x522   :  { %v2544_v58 = vadd.f32 %v2543_v57, %v2471_v17  ;;  %v2612_v59 = vpop.f32.mrb[16].mxu1 }
 0x523   :  { %v2617_v61 = vadd.f32 %v3122_v60, %v2542_v56  ;;  %v2613_v62 = vadd.f32 %v2612_v59, %v2471_v17  ;;  %v2614_v63 = vpop.f32.mrb[17].mxu1 }
 0x524   :  { %v2618_v7 = vadd.f32 %v3123_v0, %v2544_v58  ;;  %v2615_v1 = vadd.f32 %v2614_v63, %v2471_v17 }
 0x525   :  { %v2621_v15 = vmax.f32 %v2617_v61, 0.0  ;;  %v2619_v8 = vadd.f32 %v3124_v2, %v2613_v62 }
 0x526   :  { %v2622_v3 = vmax.f32 %v2618_v7, 0.0  ;;  %v2620_v6 = vadd.f32 %v3125_v4, %v2615_v1 }
 0x527   :  { %2625 = vst [vmem:[#allocation2] sm:$0xff] %v2621_v15  ;;  %v2623_v16 = vmax.f32 %v2619_v8, 0.0 }
 0x528   :  { %2626 = vst [vmem:[#allocation2 + $0x8] sm:$0xff] %v2622_v3  ;;  %v2624_v9 = vmax.f32 %v2620_v6, 0.0 }
 0x529   :  { %2627 = vst [vmem:[#allocation2 + $0x10] sm:$0xff] %v2623_v16 }
 0x52a   :  { %2628 = vst [vmem:[#allocation2 + $0x18] sm:$0xff] %v2624_v9 }
 0x52b   :  { %3137 = shalt.err (!%p3134_p4)
}
 0x52c   :  { %s3138_s3 = scalar_lea.hbm %s3865_s2, 512 }
 0x52d   :  { %p3139_p5 = scmp.ne.s32.totalorder %s3865_s2, %s3138_s3  ;;  %p3142_p6 = scmp.lt.u32.totalorder %s3138_s3, %s3865_s2 }
 0x52f   :  { %p3144_p7 = pnand %p3142_p6, %p3139_p5 }
 0x531   :  { %3147 = shalt.err (!%p3144_p7)
}
 0x532   :  { %2638 = dma.vmem_to_hbm [thread:$0]  %s2636_s25, 512, %s3865_s2, [#allocation3]  }
 0x533   :  { %3148 = dma.done.wait [#allocation3], 512  }
 0x534   :  { %3149 = vsyncadd [#allocation3], 4294966784 }
 0x535   :  { %2642 = vsyncpa [#allocation3], 1 }

</bundles_post_ra>
